<compile_context>
chip_gen: v6e
topology: v6e:2x2x1
jax: 0.10.0
libtpu: 0.0.40
codegen_flags: <defaults>
</compile_context>

<pallas_src>
import numpy as np
import jax
import jax.numpy as jnp
from jax.experimental import pallas as pl
from jax.experimental.pallas import tpu as pltpu


# MXU-input dtype. bf16 is the fast MXU path on v5e/v6e/v7x; accumulation is f32.
_MXU_DTYPE = jnp.bfloat16
_LANES = 128


# ----------------------------------------------------------------------------
# helpers (identical semantics to the torch module)
# ----------------------------------------------------------------------------
def _cal_conv_padding(input_len, output_len, kernel_size, n_strides, dilation_rate):
    padding_diff = (output_len - 1) * n_strides + (dilation_rate * (kernel_size - 1) + 1) - input_len
    padding = int(np.ceil(padding_diff / 2))
    output_padding = 2 * padding - padding_diff
    return padding, output_padding


def _gelu(x):
    # tanh-form GELU (EUP tanh + a few VALU ops).  |tanh-form - erf-form| < 3e-3
    # everywhere and is orders of magnitude smaller at the pre-activation scales
    # seen here — well inside the reference-check tolerance.
    c0 = 0.7978845608028654  # sqrt(2/pi)
    return 0.5 * x * (1.0 + jnp.tanh(c0 * (x + 0.044715 * (x * x * x))))


def _matmul(a, w_f32):
    # bf16 MXU inputs, f32 accumulation.
    return jnp.dot(a.astype(_MXU_DTYPE), w_f32.astype(_MXU_DTYPE),
                   preferred_element_type=jnp.float32)


# ----------------------------------------------------------------------------
# in-kernel building blocks
# ----------------------------------------------------------------------------
def _deconv_layer(h, p_ref, scratch_ref, cfg):
    """ConvTranspose1d on a batch-flattened (M_in, C_in) activation.

    Rows are ordered p = b*L_in + m; output rows p_out = b*L_out + (m*stride + r).
    y[b, m*stride + r] = bias + sum_{k in group(r,j)} x[b, m - j] @ W[k]
    """
    K, C_out, stride = cfg["K"], cfg["C_out"], cfg["stride"]
    pad, dil = cfg["padding"], cfg["dilation"]
    L_in, M_in = cfg["L_in"], cfg["M_in"]
    w_off, w_r, w_c = cfg["w_seg"]
    b_off, _, _ = cfg["b_seg"]

    w = p_ref[w_off:w_off + w_r, :w_c]            # (C_in, K*C_out): taps folded along lanes
    bias = p_ref[b_off:b_off + 1, :C_out]         # (1, C_out)
    contrib = _matmul(h, w)                       # ONE wide MXU matmul: (M_in, K*C_out)

    # Group taps by (output residue r, input row shift j).
    groups = {}
    for k in range(K):
        off = dil * k - pad
        r = off % stride
        j = (off - r) // stride
        if abs(j) >= L_in:
            continue                              # tap never lands inside the output window
        groups.setdefault((r, j), []).append(k)

    # m (row index within each batch element) — used to zero rolled/wrapped rows.
    m_idx = jax.lax.broadcasted_iota(jnp.int32, (M_in, 1), 0) % L_in

    subs = [None] * stride
    for (r, j), ks in sorted(groups.items()):
        c = contrib[:, ks[0] * C_out:(ks[0] + 1) * C_out]
        for k in ks[1:]:
            c = c + contrib[:, k * C_out:(k + 1) * C_out]
        if j != 0:
            # Zero-filled row shift: shifted[p] = c[p - j].  XLU sublane rotate
            # (np.roll semantics) + periodic mask for the wrapped / cross-batch rows.
            c = pltpu.roll(c, shift=j % M_in, axis=0)
            valid = (m_idx >= j) if j > 0 else (m_idx < L_in + j)
            c = jnp.where(valid, c, 0.0)
        subs[r] = c if subs[r] is None else subs[r] + c

    if stride == 1:
        out = subs[0] if subs[0] is not None else jnp.zeros((M_in, C_out), jnp.float32)
        return out + bias

    # Sub-pixel interleave via sublane-strided stores into VMEM scratch
    # (row m*stride + r <- sub_r[m]); avoids the lane->sublane relayout reshape.
    zeros = None
    for r in range(stride):
        val = subs[r]
        if val is None:
            if zeros is None:
                zeros = jnp.zeros((M_in, C_out), jnp.float32)
            val = zeros
        scratch_ref[pl.ds(r, M_in, stride=stride), :] = val
    return scratch_ref[...] + bias


def _hidden_layer(h, p_ref, cfg):
    """Linear + GELU + LayerNorm(eps=1e-5); rows independent -> batch-flattened."""
    H = cfg["H"]
    w_off, w_r, _ = cfg["w_seg"]
    v_off, _, _ = cfg["v_seg"]
    w = p_ref[w_off:w_off + w_r, :H]
    b = p_ref[v_off:v_off + 1, :H]
    g = p_ref[v_off + 1:v_off + 2, :H]
    be = p_ref[v_off + 2:v_off + 3, :H]
    z = _matmul(h, w) + b
    z = _gelu(z)
    mu = jnp.mean(z, axis=-1, keepdims=True)
    zc = z - mu
    var = jnp.mean(zc * zc, axis=-1, keepdims=True)
    return zc * jax.lax.rsqrt(var + 1e-5) * g + be


def _make_kernel(deconv_cfgs, hidden_cfgs, final_cfg):
    def kernel(x_ref, p_ref, o_ref, *scratch_refs):
        h = x_ref[...].astype(jnp.float32)        # (Bt*L0, C0) — batch folded into rows
        for cfg in deconv_cfgs:
            sref = scratch_refs[cfg["scratch_idx"]] if cfg["scratch_idx"] is not None else None
            h = _deconv_layer(h, p_ref, sref, cfg)
        for cfg in hidden_cfgs:
            h = _hidden_layer(h, p_ref, cfg)
        w_off, w_r, _ = final_cfg["w_seg"]
        b_off, _, _ = final_cfg["b_seg"]
        N = final_cfg["N"]
        out = _matmul(h, p_ref[w_off:w_off + w_r, :N]) + p_ref[b_off:b_off + 1, :N]
        o_ref[...] = out.astype(o_ref.dtype)
    return kernel


# ----------------------------------------------------------------------------
# full PatchRGSHead forward: ONE pallas_call, grid over batch blocks
# ----------------------------------------------------------------------------
def patch_rgs_head_forward(weights, emb, hp, *, batch_block=None):
    B = emb.shape[0]
    sprod = int(np.prod(hp["n_strides"]))
    d_model_new = hp["d_model"] // (hp["seg_len"] // sprod)
    x = emb.reshape(B, -1, d_model_new).astype(jnp.float32)     # LambdaLayer reshape
    L0, C0 = x.shape[1], x.shape[2]
    L_final = L0 * sprod

    # Batch block: fold enough batch elements into the matmul M dim (>=256 rows when
    # possible).  For tiny B this collapses the grid to a single step.
    if batch_block is None:
        Bt = B
        for cand in range(1, B + 1):
            if (B % cand == 0 and cand * L_final >= 256
                    and (cand * L0) % 8 == 0 and (cand * L_final) % 8 == 0):
                Bt = cand
                break
    else:
        Bt = batch_block
    assert B % Bt == 0
    grid = (B // Bt,)

    # ---- pack ALL parameters into one lane-padded f32 array (single weight DMA) ----
    segs = []
    cursor = 0

    def add_seg(arr):
        nonlocal cursor
        arr = jnp.asarray(arr, jnp.float32)
        if arr.ndim == 1:
            arr = arr.reshape(1, -1)
        off = cursor
        segs.append((off, arr))
        cursor = off + ((arr.shape[0] + 7) // 8) * 8            # keep segments sublane-aligned
        return (off, arr.shape[0], arr.shape[1])

    deconv_cfgs = []
    L, c_in = L0, C0
    for idx in range(len(hp["n_filters"])):
        s = hp["n_strides"][idx]
        k = hp["kernel_sizes"][idx]
        d = hp["dilation_rates"][idx]
        seq_len = L * s                                         # module's seq_len bookkeeping
        pad, opad = _cal_conv_padding(seq_len * s, seq_len, k, s, d)
        w, b = weights["deconv"][idx]                           # (K, C_in, C_out), (C_out,)
        c_out = w.shape[2]
        L_out = L * s
        torch_l_out = (L - 1) * s - 2 * pad + d * (k - 1) + 1 + opad
        assert torch_l_out == L_out, (torch_l_out, L_out)       # padding bookkeeping guard
        w_fold = jnp.transpose(w, (1, 0, 2)).reshape(c_in, k * c_out)   # taps folded in lanes
        deconv_cfgs.append(dict(K=k, C_out=c_out, stride=s, padding=pad, dilation=d,
                                L_in=L, M_in=Bt * L,
                                w_seg=add_seg(w_fold), b_seg=add_seg(b)))
        L, c_in = L_out, c_out

    hidden_cfgs = []
    for (w, b, g, be) in weights["hidden"]:
        hidden_cfgs.append(dict(H=w.shape[1], w_seg=add_seg(w),
                                v_seg=add_seg(jnp.stack([b, g, be], axis=0))))

    wf, bf = weights["final"]
    n_out = wf.shape[1]
    final_cfg = dict(N=n_out, w_seg=add_seg(wf), b_seg=add_seg(bf))

    lanes = int(np.ceil(max(a.shape[1] for _, a in segs) / _LANES)) * _LANES
    rows = ((cursor + 7) // 8) * 8
    packed = jnp.zeros((rows, lanes), jnp.float32)
    for off, a in segs:
        packed = packed.at[off:off + a.shape[0], :a.shape[1]].set(a)

    # ---- VMEM scratch per deconv layer for the strided-store interleave ----
    scratch_shapes = []
    for cfg in deconv_cfgs:
        if cfg["stride"] > 1:
            scratch_shapes.append(
                pltpu.VMEM((cfg["M_in"] * cfg["stride"], cfg["C_out"]), jnp.float32))
            cfg["scratch_idx"] = len(scratch_shapes) - 1
        else:
            cfg["scratch_idx"] = None

    kernel = _make_kernel(deconv_cfgs, hidden_cfgs, final_cfg)
    x_flat = x.reshape(B * L0, C0)

    out_flat = pl.pallas_call(
        kernel,
        out_shape=jax.ShapeDtypeStruct((B * L_final, n_out), jnp.float32),
        grid=grid,
        in_specs=[
            pl.BlockSpec((Bt * L0, C0), lambda i: (i, 0)),      # batch block of activations
            pl.BlockSpec((rows, lanes), lambda i: (0, 0)),      # packed params (constant index -> fetched once)
        ],
        out_specs=pl.BlockSpec((Bt * L_final, n_out), lambda i: (i, 0)),
        scratch_shapes=scratch_shapes,
        compiler_params=pltpu.CompilerParams(
            dimension_semantics=("parallel",),                  # megacore split on v7x when grid > 1
        ),
    )(x_flat, packed)
    return out_flat.reshape(B, L_final, n_out)


# ----------------------------------------------------------------------------
# deterministic parameter construction (shapes from the module's __init__)
# ----------------------------------------------------------------------------
def init_weights(key, hp):
    sprod = int(np.prod(hp["n_strides"]))
    d_model_new = hp["d_model"] // (hp["seg_len"] // sprod)
    ws = {"deconv": [], "hidden": []}
    c_in = d_model_new
    for idx in range(len(hp["n_filters"])):
        c_out = hp["n_filters"][idx]
        k = hp["kernel_sizes"][idx]
        key, k1, k2 = jax.random.split(key, 3)
        # torch ConvTranspose1d weight is (C_in, C_out, K); stored here as (K, C_in, C_out)
        w = jax.random.normal(k1, (k, c_in, c_out), jnp.float32) * 0.1
        b = jax.random.normal(k2, (c_out,), jnp.float32) * 0.1
        ws["deconv"].append((w, b))
        c_in = c_out
    f_in = hp["n_filters"][-1]
    for hdim in hp["d_hidden"]:
        key, k1 = jax.random.split(key)
        w = jax.random.normal(k1, (f_in, hdim), jnp.float32) * 0.02   # trunc_normal(std=0.02)-like
        ws["hidden"].append((w, jnp.zeros((hdim,), jnp.float32),
                             jnp.ones((hdim,), jnp.float32), jnp.zeros((hdim,), jnp.float32)))
        f_in = hdim
    key, k1 = jax.random.split(key)
    wf = jax.random.normal(k1, (f_in, hp["n_channels"]), jnp.float32) * 0.02
    bf = jnp.zeros((hp["n_channels"],), jnp.float32)
    ws["final"] = (wf, bf)
    return ws


# ----------------------------------------------------------------------------
# pure-JAX reference (no Pallas), exact-erf GELU, for a sanity check
# ----------------------------------------------------------------------------
def reference_forward(weights, emb, hp):
    B = emb.shape[0]
    sprod = int(np.prod(hp["n_strides"]))
    d_model_new = hp["d_model"] // (hp["seg_len"] // sprod)
    x = emb.reshape(B, -1, d_model_new).astype(jnp.float32)
    for idx in range(len(hp["n_filters"])):
        s = hp["n_strides"][idx]
        kk = hp["kernel_sizes"][idx]
        d = hp["dilation_rates"][idx]
        seq_len = x.shape[1] * s
        pad, _ = _cal_conv_padding(seq_len * s, seq_len, kk, s, d)
        w, b = weights["deconv"][idx]
        L_in = x.shape[1]
        L_out = L_in * s
        C_out = w.shape[2]
        y = jnp.zeros((B, L_out, C_out), jnp.float32) + b[None, None, :]
        for i in range(L_in):
            for k in range(kk):
                t = i * s + d * k - pad
                if 0 <= t < L_out:
                    y = y.at[:, t, :].add(x[:, i, :] @ w[k])
        x = y
    h = x.reshape(-1, x.shape[-1])
    for (w, b, g, be) in weights["hidden"]:
        h = h @ w + b
        h = jax.nn.gelu(h, approximate=False)
        mu = jnp.mean(h, -1, keepdims=True)
        var = jnp.mean((h - mu) ** 2, -1, keepdims=True)
        h = (h - mu) / jnp.sqrt(var + 1e-5) * g + be
    wf, bf = weights["final"]
    out = h @ wf + bf
    return out.reshape(B, -1, wf.shape[1])


if __name__ == "__main__":
    hp = dict(
        d_model=32, emb_len=8, seg_len=8,
        n_strides=[2, 2], n_filters=[16, 8],
        kernel_sizes=[3, 3], dilation_rates=[1, 1],
        d_hidden=[32], n_channels=4,
    )
    key = jax.random.PRNGKey(0)
    key, kw, kx = jax.random.split(key, 3)
    weights = init_weights(kw, hp)

    emb = jax.random.normal(kx, (2, hp["emb_len"], hp["d_model"]), jnp.float32)

    out = jax.block_until_ready(patch_rgs_head_forward(weights, emb, hp))
    assert out.shape == (2, hp["emb_len"] * hp["seg_len"], hp["n_channels"]), out.shape

    ref = jax.block_until_ready(reference_forward(weights, emb, hp))
    # bf16 MXU inputs + tanh-GELU: observed deviation vs the f32/erf reference is a
    # few 1e-3; 2e-2 keeps comfortable margin while still catching real bugs.
    np.testing.assert_allclose(np.asarray(out), np.asarray(ref), rtol=2e-2, atol=2e-2)

    print("KERNEL_OK")
</pallas_src>

<mosaic_0001>
module attributes {stable_mosaic.version = 11 : i64} {
  func.func @kernel(%arg0: i32, %arg1: memref<32x16xf32, #tpu.memory_space<vmem>>, %arg2: memref<104x128xf32, #tpu.memory_space<vmem>>, %arg3: memref<128x4xf32, #tpu.memory_space<vmem>>, %arg4: memref<64x16xf32, #tpu.memory_space<vmem>>, %arg5: memref<128x8xf32, #tpu.memory_space<vmem>>) attributes {dimension_semantics = [#tpu.dimension_semantics<parallel>], iteration_bounds = array<i64: 1>, scalar_prefetch = 0 : i64, scratch_operands = 2 : i64, tpu.core_type = #tpu.core_type<tc>, window_params = [{transform_indices = @transform_0, window_bounds = array<i64: 32, 16>}, {pipeline_mode = #tpu.pipeline_mode<synchronous>, transform_indices = @transform_1, window_bounds = array<i64: 104, 128>}, {transform_indices = @transform_2, window_bounds = array<i64: 128, 4>}]} {
    %c0 = arith.constant 0 : index
    %c0_0 = arith.constant 0 : index
    %0 = vector.load %arg1[%c0, %c0_0] : memref<32x16xf32, #tpu.memory_space<vmem>>, vector<32x16xf32>
    %c0_1 = arith.constant 0 : index
    %c0_2 = arith.constant 0 : index
    %1 = vector.load %arg2[%c0_1, %c0_2] : memref<104x128xf32, #tpu.memory_space<vmem>>, vector<16x48xf32>
    %c16 = arith.constant 16 : index
    %c0_3 = arith.constant 0 : index
    %2 = vector.load %arg2[%c16, %c0_3] : memref<104x128xf32, #tpu.memory_space<vmem>>, vector<1x16xf32>
    %3 = arith.truncf %0 : vector<32x16xf32> to vector<32x16xbf16>
    %4 = arith.truncf %1 : vector<16x48xf32> to vector<16x48xbf16>
    %cst = arith.constant dense<0.000000e+00> : vector<32x48xf32>
    %5 = tpu.matmul %3, %4, %cst {dimension_numbers = #tpu.dot_dimension_numbers<[1], [0], [0], [1], [0, 0, 1, 1], [], []>} : vector<32x16xbf16>, vector<16x48xbf16>, vector<32x48xf32> -> vector<32x48xf32>
    %6 = tpu.iota {dimensions = array<i32: 0>} : vector<32x1xi32>
    %c16_i32 = arith.constant 16 : i32
    %c0_i32 = arith.constant 0 : i32
    %7 = arith.cmpi eq, %c16_i32, %c0_i32 : i32
    %c1_i32 = arith.constant 1 : i32
    %8 = arith.select %7, %c1_i32, %c16_i32 : i32
    %9 = vector.broadcast %8 : i32 to vector<32x1xi32>
    %10 = arith.remsi %6, %9 : vector<32x1xi32>
    %c0_i32_4 = arith.constant 0 : i32
    %11 = vector.broadcast %c0_i32_4 : i32 to vector<32x1xi32>
    %12 = arith.cmpi ne, %10, %11 : vector<32x1xi32>
    %c0_i32_5 = arith.constant 0 : i32
    %13 = vector.broadcast %c0_i32_5 : i32 to vector<32x1xi32>
    %14 = arith.cmpi slt, %10, %13 : vector<32x1xi32>
    %c0_i32_6 = arith.constant 0 : i32
    %15 = arith.cmpi slt, %8, %c0_i32_6 : i32
    %16 = vector.broadcast %15 : i1 to vector<32x1xi1>
    %17 = vector.broadcast %16 : vector<32x1xi1> to vector<32x1xi1>
    %18 = arith.xori %14, %17 : vector<32x1xi1>
    %19 = arith.andi %18, %12 : vector<32x1xi1>
    %20 = vector.broadcast %8 : i32 to vector<32x1xi32>
    %21 = arith.addi %10, %20 : vector<32x1xi32>
    %22 = arith.select %19, %21, %10 : vector<32x1xi1>, vector<32x1xi32>
    %23 = vector.extract_strided_slice %5 {offsets = [0, 16], sizes = [32, 16], strides = [1, 1]} : vector<32x48xf32> to vector<32x16xf32>
    %24 = vector.extract_strided_slice %5 {offsets = [0, 0], sizes = [32, 16], strides = [1, 1]} : vector<32x48xf32> to vector<32x16xf32>
    %c31_i32 = arith.constant 31 : i32
    %25 = tpu.dynamic_rotate %24 by %c31_i32 dim 0 : vector<32x16xf32>, i32 -> vector<32x16xf32>
    %c15_i32 = arith.constant 15 : i32
    %26 = vector.broadcast %c15_i32 : i32 to vector<32x1xi32>
    %27 = arith.cmpi slt, %22, %26 : vector<32x1xi32>
    %cst_7 = arith.constant 0.000000e+00 : f32
    %28 = vector.shape_cast %27 : vector<32x1xi1> to vector<32x1xi1>
    %29 = vector.broadcast %28 : vector<32x1xi1> to vector<32x16xi1>
    %30 = vector.broadcast %cst_7 : f32 to vector<32x16xf32>
    %31 = arith.select %29, %25, %30 : vector<32x16xi1>, vector<32x16xf32>
    %32 = vector.extract_strided_slice %5 {offsets = [0, 32], sizes = [32, 16], strides = [1, 1]} : vector<32x48xf32> to vector<32x16xf32>
    %33 = arith.addf %31, %32 : vector<32x16xf32>
    %c0_8 = arith.constant 0 : index
    %c0_9 = arith.constant 0 : index
    %34 = tpu.strided_load %arg4[%c0_8, %c0_9] {strides = array<i32: 2, 1>} : memref<64x16xf32, #tpu.memory_space<vmem>>, vector<32x16xf32>
    tpu.strided_store %arg4[%c0_8, %c0_9], %23 {strides = array<i32: 2, 1>} : memref<64x16xf32, #tpu.memory_space<vmem>>, vector<32x16xf32>
    %c1 = arith.constant 1 : index
    %c0_10 = arith.constant 0 : index
    %35 = tpu.strided_load %arg4[%c1, %c0_10] {strides = array<i32: 2, 1>} : memref<64x16xf32, #tpu.memory_space<vmem>>, vector<32x16xf32>
    tpu.strided_store %arg4[%c1, %c0_10], %33 {strides = array<i32: 2, 1>} : memref<64x16xf32, #tpu.memory_space<vmem>>, vector<32x16xf32>
    %c0_11 = arith.constant 0 : index
    %c0_12 = arith.constant 0 : index
    %36 = vector.load %arg4[%c0_11, %c0_12] : memref<64x16xf32, #tpu.memory_space<vmem>>, vector<64x16xf32>
    %37 = vector.broadcast %2 : vector<1x16xf32> to vector<64x16xf32>
    %38 = arith.addf %36, %37 : vector<64x16xf32>
    %c24 = arith.constant 24 : index
    %c0_13 = arith.constant 0 : index
    %39 = vector.load %arg2[%c24, %c0_13] : memref<104x128xf32, #tpu.memory_space<vmem>>, vector<16x24xf32>
    %c40 = arith.constant 40 : index
    %c0_14 = arith.constant 0 : index
    %40 = vector.load %arg2[%c40, %c0_14] : memref<104x128xf32, #tpu.memory_space<vmem>>, vector<1x8xf32>
    %41 = arith.truncf %38 : vector<64x16xf32> to vector<64x16xbf16>
    %42 = arith.truncf %39 : vector<16x24xf32> to vector<16x24xbf16>
    %cst_15 = arith.constant dense<0.000000e+00> : vector<64x24xf32>
    %43 = tpu.matmul %41, %42, %cst_15 {dimension_numbers = #tpu.dot_dimension_numbers<[1], [0], [0], [1], [0, 0, 1, 1], [], []>} : vector<64x16xbf16>, vector<16x24xbf16>, vector<64x24xf32> -> vector<64x24xf32>
    %44 = tpu.iota {dimensions = array<i32: 0>} : vector<64x1xi32>
    %c32_i32 = arith.constant 32 : i32
    %c0_i32_16 = arith.constant 0 : i32
    %45 = arith.cmpi eq, %c32_i32, %c0_i32_16 : i32
    %c1_i32_17 = arith.constant 1 : i32
    %46 = arith.select %45, %c1_i32_17, %c32_i32 : i32
    %47 = vector.broadcast %46 : i32 to vector<64x1xi32>
    %48 = arith.remsi %44, %47 : vector<64x1xi32>
    %c0_i32_18 = arith.constant 0 : i32
    %49 = vector.broadcast %c0_i32_18 : i32 to vector<64x1xi32>
    %50 = arith.cmpi ne, %48, %49 : vector<64x1xi32>
    %c0_i32_19 = arith.constant 0 : i32
    %51 = vector.broadcast %c0_i32_19 : i32 to vector<64x1xi32>
    %52 = arith.cmpi slt, %48, %51 : vector<64x1xi32>
    %c0_i32_20 = arith.constant 0 : i32
    %53 = arith.cmpi slt, %46, %c0_i32_20 : i32
    %54 = vector.broadcast %53 : i1 to vector<64x1xi1>
    %55 = vector.broadcast %54 : vector<64x1xi1> to vector<64x1xi1>
    %56 = arith.xori %52, %55 : vector<64x1xi1>
    %57 = arith.andi %56, %50 : vector<64x1xi1>
    %58 = vector.broadcast %46 : i32 to vector<64x1xi32>
    %59 = arith.addi %48, %58 : vector<64x1xi32>
    %60 = arith.select %57, %59, %48 : vector<64x1xi1>, vector<64x1xi32>
    %61 = vector.extract_strided_slice %43 {offsets = [0, 8], sizes = [64, 8], strides = [1, 1]} : vector<64x24xf32> to vector<64x8xf32>
    %62 = vector.extract_strided_slice %43 {offsets = [0, 0], sizes = [64, 8], strides = [1, 1]} : vector<64x24xf32> to vector<64x8xf32>
    %c63_i32 = arith.constant 63 : i32
    %63 = tpu.dynamic_rotate %62 by %c63_i32 dim 0 : vector<64x8xf32>, i32 -> vector<64x8xf32>
    %c31_i32_21 = arith.constant 31 : i32
    %64 = vector.broadcast %c31_i32_21 : i32 to vector<64x1xi32>
    %65 = arith.cmpi slt, %60, %64 : vector<64x1xi32>
    %cst_22 = arith.constant 0.000000e+00 : f32
    %66 = vector.shape_cast %65 : vector<64x1xi1> to vector<64x1xi1>
    %67 = vector.broadcast %66 : vector<64x1xi1> to vector<64x8xi1>
    %68 = vector.broadcast %cst_22 : f32 to vector<64x8xf32>
    %69 = arith.select %67, %63, %68 : vector<64x8xi1>, vector<64x8xf32>
    %70 = vector.extract_strided_slice %43 {offsets = [0, 16], sizes = [64, 8], strides = [1, 1]} : vector<64x24xf32> to vector<64x8xf32>
    %71 = arith.addf %69, %70 : vector<64x8xf32>
    %c0_23 = arith.constant 0 : index
    %c0_24 = arith.constant 0 : index
    %72 = tpu.strided_load %arg5[%c0_23, %c0_24] {strides = array<i32: 2, 1>} : memref<128x8xf32, #tpu.memory_space<vmem>>, vector<64x8xf32>
    tpu.strided_store %arg5[%c0_23, %c0_24], %61 {strides = array<i32: 2, 1>} : memref<128x8xf32, #tpu.memory_space<vmem>>, vector<64x8xf32>
    %c1_25 = arith.constant 1 : index
    %c0_26 = arith.constant 0 : index
    %73 = tpu.strided_load %arg5[%c1_25, %c0_26] {strides = array<i32: 2, 1>} : memref<128x8xf32, #tpu.memory_space<vmem>>, vector<64x8xf32>
    tpu.strided_store %arg5[%c1_25, %c0_26], %71 {strides = array<i32: 2, 1>} : memref<128x8xf32, #tpu.memory_space<vmem>>, vector<64x8xf32>
    %c0_27 = arith.constant 0 : index
    %c0_28 = arith.constant 0 : index
    %74 = vector.load %arg5[%c0_27, %c0_28] : memref<128x8xf32, #tpu.memory_space<vmem>>, vector<128x8xf32>
    %75 = vector.broadcast %40 : vector<1x8xf32> to vector<128x8xf32>
    %76 = arith.addf %74, %75 : vector<128x8xf32>
    %c48 = arith.constant 48 : index
    %c0_29 = arith.constant 0 : index
    %77 = vector.load %arg2[%c48, %c0_29] : memref<104x128xf32, #tpu.memory_space<vmem>>, vector<8x32xf32>
    %c56 = arith.constant 56 : index
    %c0_30 = arith.constant 0 : index
    %78 = vector.load %arg2[%c56, %c0_30] : memref<104x128xf32, #tpu.memory_space<vmem>>, vector<1x32xf32>
    %c57 = arith.constant 57 : index
    %c0_31 = arith.constant 0 : index
    %79 = vector.load %arg2[%c57, %c0_31] : memref<104x128xf32, #tpu.memory_space<vmem>>, vector<1x32xf32>
    %c58 = arith.constant 58 : index
    %c0_32 = arith.constant 0 : index
    %80 = vector.load %arg2[%c58, %c0_32] : memref<104x128xf32, #tpu.memory_space<vmem>>, vector<1x32xf32>
    %81 = arith.truncf %76 : vector<128x8xf32> to vector<128x8xbf16>
    %82 = arith.truncf %77 : vector<8x32xf32> to vector<8x32xbf16>
    %cst_33 = arith.constant dense<0.000000e+00> : vector<128x32xf32>
    %83 = tpu.matmul %81, %82, %cst_33 {dimension_numbers = #tpu.dot_dimension_numbers<[1], [0], [0], [1], [0, 0, 1, 1], [], []>} : vector<128x8xbf16>, vector<8x32xbf16>, vector<128x32xf32> -> vector<128x32xf32>
    %84 = vector.broadcast %78 : vector<1x32xf32> to vector<128x32xf32>
    %85 = arith.addf %83, %84 : vector<128x32xf32>
    %cst_34 = arith.constant 5.000000e-01 : f32
    %86 = vector.broadcast %cst_34 : f32 to vector<128x32xf32>
    %87 = arith.mulf %86, %85 : vector<128x32xf32>
    %88 = arith.mulf %85, %85 : vector<128x32xf32>
    %89 = arith.mulf %88, %85 : vector<128x32xf32>
    %cst_35 = arith.constant 4.471500e-02 : f32
    %90 = vector.broadcast %cst_35 : f32 to vector<128x32xf32>
    %91 = arith.mulf %90, %89 : vector<128x32xf32>
    %92 = arith.addf %85, %91 : vector<128x32xf32>
    %cst_36 = arith.constant 0.797884583 : f32
    %93 = vector.broadcast %cst_36 : f32 to vector<128x32xf32>
    %94 = arith.mulf %93, %92 : vector<128x32xf32>
    %95 = math.tanh %94 : vector<128x32xf32>
    %cst_37 = arith.constant 1.000000e+00 : f32
    %96 = vector.broadcast %cst_37 : f32 to vector<128x32xf32>
    %97 = arith.addf %96, %95 : vector<128x32xf32>
    %98 = arith.mulf %87, %97 : vector<128x32xf32>
    %cst_38 = arith.constant dense<0.000000e+00> : vector<128xf32>
    %99 = vector.multi_reduction <add>, %98, %cst_38 [1] : vector<128x32xf32> to vector<128xf32>
    %100 = vector.shape_cast %99 : vector<128xf32> to vector<128x1xf32>
    %cst_39 = arith.constant 3.200000e+01 : f32
    %101 = vector.broadcast %cst_39 : f32 to vector<128x1xf32>
    %102 = arith.divf %100, %101 : vector<128x1xf32>
    %103 = vector.broadcast %102 : vector<128x1xf32> to vector<128x32xf32>
    %104 = arith.subf %98, %103 : vector<128x32xf32>
    %105 = arith.mulf %104, %104 : vector<128x32xf32>
    %cst_40 = arith.constant dense<0.000000e+00> : vector<128xf32>
    %106 = vector.multi_reduction <add>, %105, %cst_40 [1] : vector<128x32xf32> to vector<128xf32>
    %107 = vector.shape_cast %106 : vector<128xf32> to vector<128x1xf32>
    %cst_41 = arith.constant 3.200000e+01 : f32
    %108 = vector.broadcast %cst_41 : f32 to vector<128x1xf32>
    %109 = arith.divf %107, %108 : vector<128x1xf32>
    %cst_42 = arith.constant 9.99999974E-6 : f32
    %110 = vector.broadcast %cst_42 : f32 to vector<128x1xf32>
    %111 = arith.addf %109, %110 : vector<128x1xf32>
    %112 = math.rsqrt %111 : vector<128x1xf32>
    %113 = vector.broadcast %112 : vector<128x1xf32> to vector<128x32xf32>
    %114 = arith.mulf %104, %113 : vector<128x32xf32>
    %115 = vector.broadcast %79 : vector<1x32xf32> to vector<128x32xf32>
    %116 = arith.mulf %114, %115 : vector<128x32xf32>
    %117 = vector.broadcast %80 : vector<1x32xf32> to vector<128x32xf32>
    %118 = arith.addf %116, %117 : vector<128x32xf32>
    %c64 = arith.constant 64 : index
    %c0_43 = arith.constant 0 : index
    %119 = vector.load %arg2[%c64, %c0_43] : memref<104x128xf32, #tpu.memory_space<vmem>>, vector<32x4xf32>
    %120 = arith.truncf %118 : vector<128x32xf32> to vector<128x32xbf16>
    %121 = arith.truncf %119 : vector<32x4xf32> to vector<32x4xbf16>
    %cst_44 = arith.constant dense<0.000000e+00> : vector<128x4xf32>
    %122 = tpu.matmul %120, %121, %cst_44 {dimension_numbers = #tpu.dot_dimension_numbers<[1], [0], [0], [1], [0, 0, 1, 1], [], []>} : vector<128x32xbf16>, vector<32x4xbf16>, vector<128x4xf32> -> vector<128x4xf32>
    %c96 = arith.constant 96 : index
    %c0_45 = arith.constant 0 : index
    %123 = vector.load %arg2[%c96, %c0_45] : memref<104x128xf32, #tpu.memory_space<vmem>>, vector<1x4xf32>
    %124 = vector.broadcast %123 : vector<1x4xf32> to vector<128x4xf32>
    %125 = arith.addf %122, %124 : vector<128x4xf32>
    %c0_46 = arith.constant 0 : index
    %c0_47 = arith.constant 0 : index
    %126 = vector.load %arg3[%c0_46, %c0_47] : memref<128x4xf32, #tpu.memory_space<vmem>>, vector<128x4xf32>
    tpu.vector_store %arg3[%c0_46, %c0_47], %125 {strides = array<i32>} : memref<128x4xf32, #tpu.memory_space<vmem>>, vector<128x4xf32>,
    return
  }
  func.func @transform_0(%arg0: i32) -> (i32, i32) {
    %c0_i32 = arith.constant 0 : i32
    %c0_i32_0 = arith.constant 0 : i32
    return %arg0, %c0_i32 : i32, i32
  }
  func.func @transform_1(%arg0: i32) -> (i32, i32) {
    %c0_i32 = arith.constant 0 : i32
    %c0_i32_0 = arith.constant 0 : i32
    %c0_i32_1 = arith.constant 0 : i32
    return %c0_i32, %c0_i32_0 : i32, i32
  }
  func.func @transform_2(%arg0: i32) -> (i32, i32) {
    %c0_i32 = arith.constant 0 : i32
    %c0_i32_0 = arith.constant 0 : i32
    return %arg0, %c0_i32 : i32, i32
  }
}

</mosaic_0001>

<bundles_post_ra>
// kernel: tpu_custom_call.1
= control target key start
LH: loop header
LB: loop body
LE: loop exit
PB: predicated region body
PF: predicated region fallthrough
CT: control target
= control target key end

     0   :  { %7 = vsyncpa [#allocation5], 0  ;;  %s1502_s9 = smov [#allocation4]   ;;  %s2041_s0 = inlined_call_operand.vmem [shape: f32[32,16], index: 0, kind: input, shape index: {}]   ;;  %s2042_s1 = inlined_call_operand.hbm [shape: f32[104,128], index: 1, kind: input, shape index: {}]   ;;  %s2043_s2 = inlined_call_operand.vmem [shape: f32[128,4], index: 2, kind: output, shape index: {}]  }
   0x1   :  { %s15_s10 = sshll.u32 %s1502_s9, 4  ;;  %s16_s10 = int_to_ptr.vmem [resolvable:$true] %s15_s10 }
   0x2   :  { %s1488_s11 = scalar_lea.vmem %s16_s10, 1664  ;;  %p1493_p1 = scmp.lt.s32.totalorder %s16_s10, %s16_s10 }
   0x3   :  { %p1489_p0 = scmp.ne.s32.totalorder %s16_s10, %s1488_s11  ;;  %p1494_p2 = scmp.lt.s32.totalorder %s1488_s11, %s1488_s11 }
   0x5   :  { %p1495_p3 = por %p1494_p2, %p1493_p1 }
   0x7   :  { %p1496_p4 = pnand %p1495_p3, %p1489_p0 }
   0x9   :  { %1499 = shalt.err (!%p1496_p4)
}
   0xa   :  { %s1503_s12 = smov 128   ;;  %s1504_s13 = smov 8  }
   0xb   :  { %21 = dma.hbm_to_vmem [thread:$0]  %s2042_s1, 1664, %s16_s10, [#allocation5], %s1503_s12, %s1503_s12, %s1504_s13  }
   0xc   :  { %1500 = dma.done.wait [#allocation5], 1664  }
   0xd   :  { %1501 = vsyncadd [#allocation5], 4294965632  ;;  %v30_v0 = vld [vmem:[#allocation4] sm:$0xff]  ;;  %v31_v1 = vld [vmem:[#allocation4 + $0x8] sm:$0xff]  ;;  %vm36_vm0 = vcmask 130048   ;;  %v92_v9 = vlaneseq  ;;  %s1505_s23 = smov 112  }
   0xe   :  { %v26_v2 = vld [vmem:[%s2041_s0] sm:$0xff]  ;;  %v35_v3 = vpack.c.bf16 %v31_v1, %v30_v0  ;;  %v27_v4 = vld [vmem:[%s2041_s0 + $0x8] sm:$0xff]  ;;  %v28_v5 = vld [vmem:[%s2041_s0 + $0x10] sm:$0xff]  ;;  %vm643_vm4 = vcmask 1043456   ;;  %s1507_s24 = smov 120   ;;  %vm618_vm6 = vcmask 64512  }
   0xf   :  { %v29_v6 = vld [vmem:[%s2041_s0 + $0x18] sm:$0xff]  ;;  %v33_v7 = vpack.c.bf16 %v27_v4, %v26_v2  ;;  %v238_v12 = vld [vmem:[#allocation4 + $0x20] sm:$0xff]  ;;  %v1540_v14 = vshrl.u32 %v92_v9, 7  ;;  %s1506_s0 = smov 96   ;;  %v1302_v40 = vld [vmem:[#allocation4 + $0x10] ss:$0 sm:$0xff] }
  0x10   :  { %1355 = vmatprep.subr.bf16.mxu0 %v35_v3  ;;  %v34_v8 = vpack.c.bf16 %v29_v6, %v28_v5  ;;  %v237_v11 = vld [vmem:[#allocation4 + $0x18] sm:$0xff]  ;;  %v601_v2 = vld [vmem:[#allocation4 + $0x30] sm:$0xff]  ;;  %vm888_vm8 = vcmask 261120   ;;  %vm1278_vm9 = vcmask 31744  }
  0x11   :  { %1356 = vmatpush3.bf16.msra.mxu0 %v35_v3  ;;  %1357 = vmatprep.mubr.msk.bf16.mxu0 %vm36_vm0, %v33_v7  ;;  %v244_v15 = vpack.c.bf16 %v238_v12, %v237_v11  ;;  %vm149_vm1 = vcmp.lt.s32.totalorder %v1540_v14, 7  ;;  %v94_v23 = vadd.s32 8, %v1540_v14  ;;  %v1553_v26 = vadd.s32 24, %v1540_v14 }
  0x12   :  { %v613_v3 = vpack.c.bf16 %v601_v2, %v601_v2 }
  0x13   :  { %1361 = vmatprep.subr.bf16.mxu1 %v244_v15  ;;  %v108_v25 = vand.u32 15, %v94_v23  ;;  %v122_v32 = vand.u32 15, %v1553_v26 }
  0x14   :  { %1358 = vmatmul.mubr.msk.bf16.vlgmr.msra.gmra.mxu0 %vm36_vm0, %v34_v8  ;;  %1362 = vmatpush3.bf16.msra.mxu1 %v244_v15  ;;  %v645_v6 = vsel %vm643_vm4, %v613_v3, 0 }
  0x15   :  { %vm155_vm2 = vcmp.lt.s32.totalorder %v108_v25, 15  ;;  %vm157_vm3 = vcmp.lt.s32.totalorder %v122_v32, 15  ;;  %1409 = vmatprep.subr.msk.bf16.mxu0 %vm643_vm4, %v613_v3  ;;  %v351_v32 = vand.u32 31, %v1553_v26 }
  0x16   :  { %1372 = vmatpush3.bf16.msra.mxu0 %v645_v6 }
  0x17   :  { %vm441_vm5 = vcmp.lt.s32.totalorder %v351_v32, 31 }
  0xd4   :  { %v1359_v10 = vpop.f32.mrf.mxu0 }
  0xd5   :  { %v147_v17 = vrot.slane %v1359_v10, 1 }
  0xd6   :  { %v77_v13 = vpop.f32.mrf.mxu0 }
  0xd7   :  { %190 = vrot.lane.b32.xlu1 %v77_v13, %s1505_s23  ;;  %174 = vrot.lane.b32.xlu0 %v77_v13, %s1506_s0  ;;  %v145_v18 = vrot.slane %v77_v13, 1 }
  0xd8   :  { %v1360_v16 = vpop.f32.mrf.mxu0 }
  0xd9   :  { %v148_v19 = vrot.slane %v1360_v16, 1 }
  0xda   :  { %v80_v20 = vpop.f32.mrf.mxu0 }
  0xdb   :  { %192 = vrot.lane.b32.xlu1 %v80_v20, %s1505_s23  ;;  %176 = vrot.lane.b32.xlu0 %v80_v20, %s1506_s0  ;;  %v153_v21 = vsel %vm149_vm1, %v148_v19, %v145_v18  ;;  %v150_v22 = vsel %vm149_vm1, %v147_v17, %v148_v19  ;;  %v146_v24 = vrot.slane %v80_v20, 1 }
  0xdc   :  { %v169_v37 = vsel %vm157_vm3, %v153_v21, 0.0 }
  0xdd   :  { %v152_v29 = vsel %vm149_vm1, %v145_v18, %v146_v24  ;;  %v151_v31 = vsel %vm149_vm1, %v146_v24, %v147_v17 }
  0xde   :  { %v167_v35 = vsel %vm155_vm2, %v151_v31, 0.0 }
  0xdf   :  { %180 = vrot.lane.b32.xlu1 %v1360_v16, %s1506_s0  ;;  %178 = vrot.lane.b32.xlu0 %v1359_v10, %s1506_s0 }
  0xe3   :  { %196 = vrot.lane.b32.xlu1 %v1360_v16, %s1505_s23  ;;  %194 = vrot.lane.b32.xlu0 %v1359_v10, %s1505_s23 }
 0x149   :  { %v191_v27 = vpop.permute.xlu1 %190  ;;  %v175_v28 = vpop.permute.xlu0 %174 }
 0x14a   :  { %202 = vst [vmem:[#allocation2] ss:$2 sm:$0xff] %v191_v27  ;;  %v186_v30 = vadd.f32 %v175_v28, %v152_v29 }
 0x14c   :  { %210 = vst [vmem:[#allocation2 + $0x1] ss:$2 sm:$0xff] %v186_v30 }
 0x14d   :  { %v193_v33 = vpop.permute.xlu1 %192  ;;  %v177_v34 = vpop.permute.xlu0 %176 }
 0x14e   :  { %204 = vst [vmem:[#allocation2 + $0x10] ss:$2 sm:$0xff] %v193_v33  ;;  %v187_v36 = vadd.f32 %v177_v34, %v167_v35 }
 0x150   :  { %212 = vst [vmem:[#allocation2 + $0x11] ss:$2 sm:$0xff] %v187_v36  ;;  %v1594_v36 = vld [vmem:[#allocation4 + $0x28] ss:$0 sm:$0xff] }
 0x151   :  { %v181_v38 = vpop.permute.xlu1 %180  ;;  %v179_v39 = vpop.permute.xlu0 %178 }
 0x152   :  { %v189_v41 = vadd.f32 %v181_v38, %v169_v37  ;;  %v188_v42 = vadd.f32 %v179_v39, %v150_v22 }
 0x153   :  { %v217_v43 = vld [vmem:[#allocation2] sm:$0xff]  ;;  %v218_v44 = vld [vmem:[#allocation2 + $0x8] sm:$0xff] }
 0x154   :  { %216 = vst [vmem:[#allocation2 + $0x31] ss:$2 sm:$0xff] %v189_v41  ;;  %214 = vst [vmem:[#allocation2 + $0x21] ss:$2 sm:$0xff] %v188_v42  ;;  %v229_v45 = vadd.f32 %v1302_v40, %v217_v43  ;;  %v230_v46 = vadd.f32 %v1302_v40, %v218_v44 }
 0x155   :  { %v197_v47 = vpop.permute.xlu1 %196  ;;  %v195_v48 = vpop.permute.xlu0 %194 }
 0x156   :  { %208 = vst [vmem:[#allocation2 + $0x30] ss:$2 sm:$0xff] %v197_v47  ;;  %206 = vst [vmem:[#allocation2 + $0x20] ss:$2 sm:$0xff] %v195_v48  ;;  %v240_v49 = vpack.c.bf16 %v230_v46, %v229_v45 }
 0x157   :  { %v219_v50 = vld [vmem:[#allocation2 + $0x10] sm:$0xff]  ;;  %v220_v51 = vld [vmem:[#allocation2 + $0x18] sm:$0xff] }
 0x158   :  { %1363 = vmatprep.mubr.msk.bf16.mxu1 %vm36_vm0, %v240_v49  ;;  %v231_v52 = vadd.f32 %v1302_v40, %v219_v50  ;;  %v232_v53 = vadd.f32 %v1302_v40, %v220_v51 }
 0x15a   :  { %v241_v54 = vpack.c.bf16 %v232_v53, %v231_v52 }
 0x15c   :  { %1364 = vmatmul.mubr.msk.bf16.vlgmr.msra.gmra.mxu1 %vm36_vm0, %v241_v54  ;;  %v325_v54 = vadd.s32 56, %v1540_v14 }
 0x15d   :  { %v221_v55 = vld [vmem:[#allocation2 + $0x20] sm:$0xff]  ;;  %v222_v56 = vld [vmem:[#allocation2 + $0x28] sm:$0xff]  ;;  %v223_v57 = vld [vmem:[#allocation2 + $0x30] sm:$0xff] }
 0x15e   :  { %v233_v58 = vadd.f32 %v1302_v40, %v221_v55  ;;  %v234_v59 = vadd.f32 %v1302_v40, %v222_v56  ;;  %v224_v60 = vld [vmem:[#allocation2 + $0x38] sm:$0xff]  ;;  %v235_v61 = vadd.f32 %v1302_v40, %v223_v57 }
 0x15f   :  { %v236_v62 = vadd.f32 %v1302_v40, %v224_v60 }
 0x160   :  { %v242_v63 = vpack.c.bf16 %v234_v59, %v233_v58 }
 0x161   :  { %v243_v0 = vpack.c.bf16 %v236_v62, %v235_v61 }
 0x162   :  { %1367 = vmatprep.mubr.msk.bf16.mxu1 %vm36_vm0, %v242_v63 }
 0x164   :  { %1368 = vmatmul.mubr.msk.bf16.gmra.mxu1 %vm36_vm0, %v243_v0  ;;  %v379_v0 = vand.u32 31, %v325_v54 }
 0x166   :  { %vm445_vm7 = vcmp.lt.s32.totalorder %v379_v0, 31 }
 0x21c   :  { %v1365_v1 = vpop.f32.mrf.mxu1 }
 0x21d   :  { %v424_v7 = vrot.slane %v1365_v1, 1 }
 0x21e   :  { %v291_v4 = vpop.f32.mrf.mxu1 }
 0x21f   :  { %478 = vrot.lane.b32.xlu0 %v291_v4, %s1505_s23  ;;  %v422_v10 = vrot.slane %v291_v4, 1 }
 0x220   :  { %v1366_v5 = vpop.f32.mrf.mxu1 }
 0x221   :  { %v425_v8 = vrot.slane %v1366_v5, 1 }
 0x222   :  { %v294_v9 = vpop.f32.mrf.mxu1 }
 0x223   :  { %v423_v11 = vrot.slane %v294_v9, 1  ;;  %510 = vrot.lane.b32.xlu0 %v291_v4, %s1507_s24  ;;  %480 = vrot.lane.b32.xlu1 %v294_v9, %s1505_s23  ;;  %v434_v12 = vsel %vm149_vm1, %v424_v7, %v425_v8 }
 0x224   :  { %v1568_v13 = vpop.f32.mrf.mxu1 }
 0x225   :  { %v436_v15 = vsel %vm149_vm1, %v422_v10, %v423_v11  ;;  %v435_v16 = vsel %vm149_vm1, %v423_v11, %v424_v7  ;;  %v428_v20 = vrot.slane %v1568_v13, 1 }
 0x226   :  { %v307_v17 = vpop.f32.mrf.mxu1 }
 0x227   :  { %v426_v18 = vrot.slane %v307_v17, 1  ;;  %482 = vrot.lane.b32.xlu0 %v1365_v1, %s1505_s23  ;;  %512 = vrot.lane.b32.xlu1 %v294_v9, %s1507_s24 }
 0x228   :  { %v1370_v19 = vpop.f32.mrf.mxu1 }
 0x229   :  { %v429_v21 = vrot.slane %v1370_v19, 1  ;;  %v433_v22 = vsel %vm149_vm1, %v425_v8, %v426_v18 }
 0x22a   :  { %v310_v25 = vpop.f32.mrf.mxu1  ;;  %v465_v40 = vsel %vm441_vm5, %v433_v22, 0.0 }
 0x22b   :  { %514 = vrot.lane.b32.xlu0 %v1365_v1, %s1507_s24  ;;  %484 = vrot.lane.b32.xlu1 %v1366_v5, %s1505_s23  ;;  %v1581_v23 = vsel %vm149_vm1, %v428_v20, %v429_v21  ;;  %v1585_v24 = vsel %vm149_vm1, %v429_v21, %v422_v10  ;;  %v427_v37 = vrot.slane %v310_v25, 1 }
 0x22c   :  { %v469_v10 = vsel %vm445_vm7, %v1585_v24, 0.0 }
 0x22d   :  { %v432_v48 = vsel %vm149_vm1, %v426_v18, %v427_v37  ;;  %v431_v58 = vsel %vm149_vm1, %v427_v37, %v428_v20  ;;  %v1627_v37 = vld [vmem:[#allocation4 + $0x38] ss:$0 sm:$0xff] }
 0x22f   :  { %516 = vrot.lane.b32.xlu1 %v1366_v5, %s1507_s24  ;;  %486 = vrot.lane.b32.xlu0 %v307_v17, %s1505_s23 }
 0x233   :  { %518 = vrot.lane.b32.xlu0 %v307_v17, %s1507_s24  ;;  %488 = vrot.lane.b32.xlu1 %v310_v25, %s1505_s23 }
 0x237   :  { %490 = vrot.lane.b32.xlu0 %v1568_v13, %s1505_s23  ;;  %520 = vrot.lane.b32.xlu1 %v310_v25, %s1507_s24 }
 0x23b   :  { %522 = vrot.lane.b32.xlu0 %v1568_v13, %s1507_s24  ;;  %492 = vrot.lane.b32.xlu1 %v1370_v19, %s1505_s23 }
 0x23f   :  { %524 = vrot.lane.b32.xlu1 %v1370_v19, %s1507_s24 }
 0x291   :  { %v479_v27 = vpop.permute.xlu0 %478 }
 0x292   :  { %v502_v28 = vadd.f32 %v479_v27, %v436_v15 }
 0x294   :  { %550 = vst [vmem:[#allocation3 + $0x1] ss:$2 sm:$0xff] %v502_v28 }
 0x295   :  { %v511_v29 = vpop.permute.xlu0 %510  ;;  %v481_v30 = vpop.permute.xlu1 %480 }
 0x296   :  { %534 = vst [vmem:[#allocation3] ss:$2 sm:$0xff] %v511_v29  ;;  %v503_v31 = vadd.f32 %v481_v30, %v435_v16 }
 0x298   :  { %552 = vst [vmem:[#allocation3 + $0x11] ss:$2 sm:$0xff] %v503_v31 }
 0x299   :  { %v483_v33 = vpop.permute.xlu0 %482  ;;  %v513_v34 = vpop.permute.xlu1 %512 }
 0x29a   :  { %v504_v35 = vadd.f32 %v483_v33, %v434_v12  ;;  %536 = vst [vmem:[#allocation3 + $0x10] ss:$2 sm:$0xff] %v513_v34 }
 0x29c   :  { %554 = vst [vmem:[#allocation3 + $0x21] ss:$2 sm:$0xff] %v504_v35 }
 0x29d   :  { %v515_v38 = vpop.permute.xlu0 %514  ;;  %v485_v39 = vpop.permute.xlu1 %484  ;;  %v565_v41 = vld [vmem:[#allocation3] sm:$0xff]  ;;  %v566_v42 = vld [vmem:[#allocation3 + $0x8] sm:$0xff] }
 0x29e   :  { %538 = vst [vmem:[#allocation3 + $0x20] ss:$2 sm:$0xff] %v515_v38  ;;  %v505_v43 = vadd.f32 %v485_v39, %v465_v40  ;;  %v585_v44 = vadd.f32 %v1594_v36, %v565_v41  ;;  %v586_v26 = vadd.f32 %v1594_v36, %v566_v42 }
 0x2a0   :  { %556 = vst [vmem:[#allocation3 + $0x31] ss:$2 sm:$0xff] %v505_v43  ;;  %v605_v45 = vpack.c.bf16 %v586_v26, %v585_v44 }
 0x2a1   :  { %v517_v46 = vpop.permute.xlu1 %516  ;;  %v487_v47 = vpop.permute.xlu0 %486  ;;  %v567_v49 = vld [vmem:[#allocation3 + $0x10] sm:$0xff]  ;;  %v568_v50 = vld [vmem:[#allocation3 + $0x18] sm:$0xff] }
 0x2a2   :  { %540 = vst [vmem:[#allocation3 + $0x30] ss:$2 sm:$0xff] %v517_v46  ;;  %v506_v51 = vadd.f32 %v487_v47, %v432_v48  ;;  %1373 = vmatprep.mubr.msk.bf16.mxu0 %vm618_vm6, %v605_v45  ;;  %v587_v52 = vadd.f32 %v1594_v36, %v567_v49  ;;  %v588_v53 = vadd.f32 %v1594_v36, %v568_v50 }
 0x2a4   :  { %558 = vst [vmem:[#allocation3 + $0x41] ss:$2 sm:$0xff] %v506_v51  ;;  %v606_v55 = vpack.c.bf16 %v588_v53, %v587_v52 }
 0x2a5   :  { %v519_v56 = vpop.permute.xlu0 %518  ;;  %v489_v57 = vpop.permute.xlu1 %488  ;;  %v569_v59 = vld [vmem:[#allocation3 + $0x20] sm:$0xff]  ;;  %v570_v60 = vld [vmem:[#allocation3 + $0x28] sm:$0xff] }
 0x2a6   :  { %542 = vst [vmem:[#allocation3 + $0x40] ss:$2 sm:$0xff] %v519_v56  ;;  %v507_v61 = vadd.f32 %v489_v57, %v431_v58  ;;  %1374 = vmatmul.mubr.msk.bf16.vlgmr.msra.gmra.mxu0 %vm618_vm6, %v606_v55  ;;  %v589_v62 = vadd.f32 %v1594_v36, %v569_v59  ;;  %v590_v63 = vadd.f32 %v1594_v36, %v570_v60 }
 0x2a8   :  { %560 = vst [vmem:[#allocation3 + $0x51] ss:$2 sm:$0xff] %v507_v61  ;;  %v607_v1 = vpack.c.bf16 %v590_v63, %v589_v62 }
 0x2a9   :  { %v491_v2 = vpop.permute.xlu0 %490  ;;  %v521_v3 = vpop.permute.xlu1 %520  ;;  %v571_v4 = vld [vmem:[#allocation3 + $0x30] sm:$0xff]  ;;  %v572_v5 = vld [vmem:[#allocation3 + $0x38] sm:$0xff] }
 0x2aa   :  { %v508_v14 = vadd.f32 %v491_v2, %v1581_v23  ;;  %544 = vst [vmem:[#allocation3 + $0x50] ss:$2 sm:$0xff] %v521_v3  ;;  %1377 = vmatprep.mubr.msk.bf16.mxu0 %vm618_vm6, %v607_v1  ;;  %v591_v6 = vadd.f32 %v1594_v36, %v571_v4  ;;  %v592_v7 = vadd.f32 %v1594_v36, %v572_v5 }
 0x2ac   :  { %562 = vst [vmem:[#allocation3 + $0x61] ss:$2 sm:$0xff] %v508_v14  ;;  %v608_v8 = vpack.c.bf16 %v592_v7, %v591_v6 }
 0x2ad   :  { %v523_v9 = vpop.permute.xlu0 %522  ;;  %v493_v11 = vpop.permute.xlu1 %492  ;;  %v573_v12 = vld [vmem:[#allocation3 + $0x40] sm:$0xff]  ;;  %v574_v13 = vld [vmem:[#allocation3 + $0x48] sm:$0xff] }
 0x2ae   :  { %546 = vst [vmem:[#allocation3 + $0x60] ss:$2 sm:$0xff] %v523_v9  ;;  %v509_v15 = vadd.f32 %v493_v11, %v469_v10  ;;  %1378 = vmatmul.mubr.msk.bf16.gmra.mxu0 %vm618_vm6, %v608_v8  ;;  %v593_v16 = vadd.f32 %v1594_v36, %v573_v12  ;;  %v594_v17 = vadd.f32 %v1594_v36, %v574_v13 }
 0x2b0   :  { %564 = vst [vmem:[#allocation3 + $0x71] ss:$2 sm:$0xff] %v509_v15  ;;  %v609_v18 = vpack.c.bf16 %v594_v17, %v593_v16 }
 0x2b1   :  { %v525_v19 = vpop.permute.xlu1 %524  ;;  %v575_v20 = vld [vmem:[#allocation3 + $0x50] sm:$0xff]  ;;  %v576_v21 = vld [vmem:[#allocation3 + $0x58] sm:$0xff] }
 0x2b2   :  { %548 = vst [vmem:[#allocation3 + $0x70] ss:$2 sm:$0xff] %v525_v19  ;;  %1381 = vmatprep.mubr.msk.bf16.mxu0 %vm618_vm6, %v609_v18  ;;  %v595_v22 = vadd.f32 %v1594_v36, %v575_v20  ;;  %v596_v23 = vadd.f32 %v1594_v36, %v576_v21 }
 0x2b4   :  { %v610_v24 = vpack.c.bf16 %v596_v23, %v595_v22 }
 0x2b5   :  { %v577_v25 = vld [vmem:[#allocation3 + $0x60] sm:$0xff]  ;;  %v578_v27 = vld [vmem:[#allocation3 + $0x68] sm:$0xff] }
 0x2b6   :  { %1382 = vmatmul.mubr.msk.bf16.gmra.mxu0 %vm618_vm6, %v610_v24  ;;  %v597_v28 = vadd.f32 %v1594_v36, %v577_v25  ;;  %v598_v29 = vadd.f32 %v1594_v36, %v578_v27 }
 0x2b8   :  { %v611_v30 = vpack.c.bf16 %v598_v29, %v597_v28 }
 0x2b9   :  { %v579_v31 = vld [vmem:[#allocation3 + $0x70] sm:$0xff]  ;;  %v580_v32 = vld [vmem:[#allocation3 + $0x78] sm:$0xff] }
 0x2ba   :  { %1385 = vmatprep.mubr.msk.bf16.mxu0 %vm618_vm6, %v611_v30  ;;  %v599_v33 = vadd.f32 %v1594_v36, %v579_v31  ;;  %v600_v34 = vadd.f32 %v1594_v36, %v580_v32 }
 0x2bc   :  { %v612_v35 = vpack.c.bf16 %v600_v34, %v599_v33 }
 0x2be   :  { %1386 = vmatmul.mubr.msk.bf16.gmra.mxu0 %vm618_vm6, %v612_v35 }
 0x366   :  { %v1375_v38 = vpop.f32.mrf.mxu0 }
 0x367   :  { %v1630_v39 = vadd.f32 %v1375_v38, %v1627_v37 }
 0x368   :  { %v681_v40 = vpop.f32.mrf.mxu0 }
 0x369   :  { %v762_v41 = vmul.f32 %v1630_v39, %v1630_v39  ;;  %v1635_v42 = vadd.f32 %v1627_v37, %v681_v40 }
 0x36a   :  { %v1376_v43 = vpop.f32.mrf.mxu0 }
 0x36b   :  { %v778_v44 = vmul.f32 %v762_v41, %v1630_v39  ;;  %v760_v36 = vmul.f32 %v1635_v42, %v1635_v42  ;;  %v1641_v26 = vadd.f32 %v1376_v43, %v1627_v37 }
 0x36c   :  { %v684_v45 = vpop.f32.mrf.mxu0 }
 0x36d   :  { %v794_v46 = vmul.f32 0.044715, %v778_v44  ;;  %v776_v47 = vmul.f32 %v760_v36, %v1635_v42  ;;  %v763_v48 = vmul.f32 %v1641_v26, %v1641_v26  ;;  %v1647_v49 = vadd.f32 %v1627_v37, %v684_v45 }
 0x36e   :  { %v1379_v50 = vpop.f32.mrf.mxu0  ;;  %v746_v45 = vmul.f32 0.5, %v1630_v39 }
 0x36f   :  { %v810_v51 = vadd.f32 %v794_v46, %v1630_v39  ;;  %v792_v52 = vmul.f32 0.044715, %v776_v47  ;;  %v779_v53 = vmul.f32 %v763_v48, %v1641_v26  ;;  %v761_v54 = vmul.f32 %v1647_v49, %v1647_v49 }
 0x370   :  { %v1654_v55 = vadd.f32 %v1379_v50, %v1627_v37  ;;  %v697_v56 = vpop.f32.mrf.mxu0 }
 0x371   :  { %v808_v57 = vadd.f32 %v792_v52, %v1635_v42  ;;  %v795_v58 = vmul.f32 0.044715, %v779_v53  ;;  %v777_v59 = vmul.f32 %v761_v54, %v1647_v49  ;;  %v1659_v60 = vadd.f32 %v1627_v37, %v697_v56 }
 0x372   :  { %v766_v61 = vmul.f32 %v1654_v55, %v1654_v55  ;;  %v1380_v62 = vpop.f32.mrf.mxu0  ;;  %v826_v63 = vmul.f32 0.7978846, %v810_v51  ;;  %v744_v51 = vmul.f32 0.5, %v1635_v42  ;;  %v747_v54 = vmul.f32 0.5, %v1641_v26 }
 0x373   :  { %v811_v0 = vadd.f32 %v795_v58, %v1641_v26  ;;  %v793_v1 = vmul.f32 0.044715, %v777_v59  ;;  %v764_v2 = vmul.f32 %v1659_v60, %v1659_v60  ;;  %v1667_v3 = vadd.f32 %v1380_v62, %v1627_v37 }
 0x374   :  { %v782_v4 = vmul.f32 %v766_v61, %v1654_v55  ;;  %v700_v5 = vpop.f32.mrf.mxu0  ;;  %v824_v14 = vmul.f32 0.7978846, %v808_v57  ;;  %1416 = vtanh.f32 %v826_v63  ;;  %v745_v63 = vmul.f32 0.5, %v1647_v49 }
 0x375   :  { %v809_v6 = vadd.f32 %v793_v1, %v1647_v49  ;;  %v780_v7 = vmul.f32 %v764_v2, %v1659_v60  ;;  %v767_v8 = vmul.f32 %v1667_v3, %v1667_v3  ;;  %v1675_v9 = vadd.f32 %v1627_v37, %v700_v5 }
 0x376   :  { %v798_v10 = vmul.f32 0.044715, %v782_v4  ;;  %v1383_v11 = vpop.f32.mrf.mxu0  ;;  %1418 = vtanh.f32 %v824_v14  ;;  %v827_v12 = vmul.f32 0.7978846, %v811_v0  ;;  %v748_v26 = vmul.f32 0.5, %v1659_v60 }
 0x377   :  { %v796_v13 = vmul.f32 0.044715, %v780_v7  ;;  %v783_v15 = vmul.f32 %v767_v8, %v1667_v3  ;;  %v765_v16 = vmul.f32 %v1675_v9, %v1675_v9  ;;  %v1681_v17 = vadd.f32 %v1383_v11, %v1627_v37 }
 0x378   :  { %v814_v18 = vadd.f32 %v798_v10, %v1654_v55  ;;  %v713_v19 = vpop.f32.mrf.mxu0  ;;  %v825_v20 = vmul.f32 0.7978846, %v809_v6  ;;  %1420 = vtanh.f32 %v827_v12 }
 0x379   :  { %v812_v21 = vadd.f32 %v796_v13, %v1659_v60  ;;  %v799_v22 = vmul.f32 0.044715, %v783_v15  ;;  %v781_v23 = vmul.f32 %v765_v16, %v1675_v9  ;;  %v770_v24 = vmul.f32 %v1681_v17, %v1681_v17 }
 0x37a   :  { %v1689_v25 = vadd.f32 %v1627_v37, %v713_v19  ;;  %v1384_v27 = vpop.f32.mrf.mxu0  ;;  %1422 = vtanh.f32 %v825_v20  ;;  %v830_v28 = vmul.f32 0.7978846, %v814_v18 }
 0x37b   :  { %v815_v29 = vadd.f32 %v799_v22, %v1667_v3  ;;  %v797_v30 = vmul.f32 0.044715, %v781_v23  ;;  %v786_v31 = vmul.f32 %v770_v24, %v1681_v17  ;;  %v1694_v32 = vadd.f32 %v1384_v27, %v1627_v37 }
 0x37c   :  { %v768_v33 = vmul.f32 %v1689_v25, %v1689_v25  ;;  %v716_v34 = vpop.f32.mrf.mxu0  ;;  %v828_v35 = vmul.f32 0.7978846, %v812_v21  ;;  %1424 = vtanh.f32 %v830_v28 }
 0x37d   :  { %v813_v38 = vadd.f32 %v797_v30, %v1675_v9  ;;  %v802_v40 = vmul.f32 0.044715, %v786_v31  ;;  %v771_v41 = vmul.f32 %v1694_v32, %v1694_v32  ;;  %v1702_v43 = vadd.f32 %v1627_v37, %v716_v34 }
 0x37e   :  { %v784_v44 = vmul.f32 %v768_v33, %v1689_v25  ;;  %v1387_v36 = vpop.f32.mrf.mxu0  ;;  %1426 = vtanh.f32 %v828_v35  ;;  %v831_v46 = vmul.f32 0.7978846, %v815_v29 }
 0x37f   :  { %v787_v47 = vmul.f32 %v771_v41, %v1694_v32  ;;  %v769_v48 = vmul.f32 %v1702_v43, %v1702_v43  ;;  %v1710_v50 = vadd.f32 %v1387_v36, %v1627_v37  ;;  %v829_v56 = vmul.f32 0.7978846, %v813_v38 }
 0x380   :  { %v800_v52 = vmul.f32 0.044715, %v784_v44  ;;  %v729_v53 = vpop.f32.mrf.mxu0  ;;  %1428 = vtanh.f32 %v831_v46  ;;  %v818_v57 = vadd.f32 %v802_v40, %v1681_v17 }
 0x381   :  { %v1417_v39 = vpop.eup %1416  ;;  %v785_v58 = vmul.f32 %v769_v48, %v1702_v43  ;;  %v774_v59 = vmul.f32 %v1710_v50, %v1710_v50  ;;  %v1719_v61 = vadd.f32 %v1627_v37, %v729_v53  ;;  %1430 = vtanh.f32 %v829_v56 }
 0x382   :  { %v816_v42 = vadd.f32 %v800_v52, %v1689_v25  ;;  %v1388_v62 = vpop.f32.mrf.mxu0  ;;  %v803_v1 = vmul.f32 0.044715, %v787_v47  ;;  %v858_v8 = vadd.f32 1.0, %v1417_v39  ;;  %v834_v13 = vmul.f32 0.7978846, %v818_v57 }
 0x383   :  { %v1419_v0 = vpop.eup %1418  ;;  %v801_v2 = vmul.f32 0.044715, %v785_v58  ;;  %v790_v4 = vmul.f32 %v774_v59, %v1710_v50  ;;  %v772_v5 = vmul.f32 %v1719_v61, %v1719_v61  ;;  %v1728_v14 = vadd.f32 %v1388_v62, %v1627_v37 }
 0x384   :  { %v732_v6 = vpop.f32.mrf.mxu0  ;;  %v856_v7 = vadd.f32 1.0, %v1419_v0  ;;  %v832_v10 = vmul.f32 0.7978846, %v816_v42  ;;  %v819_v21 = vadd.f32 %v803_v1, %v1694_v32  ;;  %v1745_v27 = vmul.f32 %v858_v8, %v746_v45 }
 0x385   :  { %v1421_v11 = vpop.eup %1420  ;;  %v817_v49 = vadd.f32 %v801_v2, %v1702_v43  ;;  %v788_v60 = vmul.f32 %v772_v5, %v1719_v61  ;;  %v1733_v12 = vadd.f32 %v1627_v37, %v732_v6  ;;  %v806_v15 = vmul.f32 0.044715, %v790_v4 }
 0x386   :  { %v775_v16 = vmul.f32 %v1728_v14, %v1728_v14  ;;  %v1737_v18 = vmul.f32 %v856_v7, %v744_v51  ;;  %v859_v19 = vadd.f32 1.0, %v1421_v11  ;;  %1432 = vtanh.f32 %v832_v10 }
 0x387   :  { %v1423_v20 = vpop.eup %1422  ;;  %v804_v22 = vmul.f32 0.044715, %v788_v60  ;;  %v773_v23 = vmul.f32 %v1733_v12, %v1733_v12  ;;  %v833_v33 = vmul.f32 0.7978846, %v817_v49  ;;  %1434 = vtanh.f32 %v834_v13 }
 0x388   :  { %v791_v24 = vmul.f32 %v775_v16, %v1728_v14  ;;  %v889_v37 = vsel %vm888_vm8, %v1737_v18, 0.0  ;;  %v857_v28 = vadd.f32 1.0, %v1423_v20  ;;  %v822_v34 = vadd.f32 %v806_v15, %v1710_v50 }
 0x389   :  { %v1425_v29 = vpop.eup %1424  ;;  %v820_v30 = vadd.f32 %v804_v22, %v1719_v61  ;;  %v789_v31 = vmul.f32 %v773_v23, %v1733_v12  ;;  %890 = vadd.xlane.f32.xlu0 %v889_v37  ;;  %v1752_v40 = vmul.f32 %v859_v19, %v747_v54  ;;  %1436 = vtanh.f32 %v833_v33 }
 0x38a   :  { %v807_v35 = vmul.f32 0.044715, %v791_v24  ;;  %v1750_v38 = vmul.f32 %v857_v28, %v745_v63  ;;  %v862_v36 = vadd.f32 1.0, %v1425_v29  ;;  %v835_v45 = vmul.f32 0.7978846, %v819_v21 }
 0x38b   :  { %v1427_v41 = vpop.eup %1426  ;;  %v805_v44 = vmul.f32 0.044715, %v789_v31  ;;  %v895_v47 = vsel %vm888_vm8, %v1745_v27, 0.0  ;;  %v750_v54 = vmul.f32 0.5, %v1654_v55  ;;  %v836_v56 = vmul.f32 0.7978846, %v820_v30 }
 0x38c   :  { %v823_v46 = vadd.f32 %v807_v35, %v1728_v14  ;;  %v892_v48 = vsel %vm888_vm8, %v1750_v38, 0.0  ;;  %v860_v51 = vadd.f32 1.0, %v1427_v41  ;;  %1438 = vtanh.f32 %v835_v45 }
 0x38d   :  { %v1429_v52 = vpop.eup %1428  ;;  %v821_v53 = vadd.f32 %v805_v44, %v1733_v12  ;;  %896 = vadd.xlane.f32.xlu0 %v895_v47  ;;  %893 = vadd.xlane.f32.xlu1 %v892_v48  ;;  %v898_v39 = vsel %vm888_vm8, %v1752_v40, 0.0  ;;  %v749_v58 = vmul.f32 0.5, %v1675_v9  ;;  %v1766_v42 = vmul.f32 %v862_v36, %v750_v54 }
 0x38e   :  { %v1763_v57 = vmul.f32 %v860_v51, %v748_v26  ;;  %v1431_v59 = vpop.eup %1430  ;;  %1440 = vtanh.f32 %v836_v56  ;;  %v838_v63 = vmul.f32 0.7978846, %v822_v34  ;;  %v863_v55 = vadd.f32 1.0, %v1429_v52 }
 0x38f   :  { %v837_v62 = vmul.f32 0.7978846, %v821_v53  ;;  %v861_v1 = vadd.f32 1.0, %v1431_v59  ;;  %v839_v2 = vmul.f32 0.7978846, %v823_v46  ;;  %v751_v26 = vmul.f32 0.5, %v1667_v3 }
 0x390   :  { %v901_v0 = vsel %vm888_vm8, %v1763_v57, 0.0  ;;  %v907_v6 = vsel %vm888_vm8, %v1766_v42, 0.0  ;;  %v752_v8 = vmul.f32 0.5, %v1689_v25  ;;  %v754_v3 = vmul.f32 0.5, %v1681_v17 }
 0x391   :  { %899 = vadd.xlane.f32.xlu0 %v898_v39  ;;  %902 = vadd.xlane.f32.xlu1 %v901_v0  ;;  %1442 = vtanh.f32 %v837_v62  ;;  %v1770_v4 = vmul.f32 %v861_v1, %v749_v58  ;;  %v1777_v7 = vmul.f32 %v863_v55, %v751_v26  ;;  %v753_v19 = vmul.f32 0.5, %v1702_v43 }
 0x392   :  { %1444 = vtanh.f32 %v838_v63  ;;  %v755_v17 = vmul.f32 0.5, %v1694_v32  ;;  %v756_v37 = vmul.f32 0.5, %v1719_v61  ;;  %v757_v32 = vmul.f32 0.5, %v1733_v12 }
 0x393   :  { %1446 = vtanh.f32 %v839_v2  ;;  %v1433_v9 = vpop.eup %1432  ;;  %v904_v5 = vsel %vm888_vm8, %v1770_v4, 0.0  ;;  %v910_v15 = vsel %vm888_vm8, %v1777_v7, 0.0  ;;  %v758_v61 = vmul.f32 0.5, %v1710_v50 }
 0x394   :  { %v864_v10 = vadd.f32 1.0, %v1433_v9  ;;  %v1435_v11 = vpop.eup %1434  ;;  %v759_v51 = vmul.f32 0.5, %v1728_v14 }
 0x395   :  { %905 = vadd.xlane.f32.xlu0 %v904_v5  ;;  %908 = vadd.xlane.f32.xlu1 %v907_v6  ;;  %v866_v60 = vadd.f32 1.0, %v1435_v11 }
 0x396   :  { %v1780_v49 = vmul.f32 %v864_v10, %v752_v8  ;;  %v1437_v13 = vpop.eup %1436 }
 0x397   :  { %v865_v20 = vadd.f32 1.0, %v1437_v13  ;;  %v1788_v21 = vmul.f32 %v866_v60, %v754_v3 }
 0x398   :  { %v913_v16 = vsel %vm888_vm8, %v1780_v49, 0.0 }
 0x399   :  { %911 = vadd.xlane.f32.xlu0 %v910_v15  ;;  %v1439_v25 = vpop.eup %1438  ;;  %914 = vadd.xlane.f32.xlu1 %v913_v16  ;;  %v1790_v22 = vmul.f32 %v865_v20, %v753_v19  ;;  %v919_v29 = vsel %vm888_vm8, %v1788_v21, 0.0 }
 0x39a   :  { %v867_v23 = vadd.f32 1.0, %v1439_v25 }
 0x39b   :  { %v1441_v24 = vpop.eup %1440  ;;  %v916_v28 = vsel %vm888_vm8, %v1790_v22, 0.0 }
 0x39c   :  { %v1798_v43 = vmul.f32 %v867_v23, %v755_v17  ;;  %v868_v30 = vadd.f32 1.0, %v1441_v24 }
 0x39d   :  { %917 = vadd.xlane.f32.xlu0 %v916_v28  ;;  %920 = vadd.xlane.f32.xlu1 %v919_v29 }
 0x39e   :  { %v1443_v31 = vpop.eup %1442  ;;  %v1800_v34 = vmul.f32 %v868_v30, %v756_v37  ;;  %v922_v36 = vsel %vm888_vm8, %v1798_v43, 0.0 }
 0x39f   :  { %v1445_v33 = vpop.eup %1444  ;;  %v869_v35 = vadd.f32 1.0, %v1443_v31 }
 0x3a0   :  { %v1447_v41 = vpop.eup %1446  ;;  %v870_v44 = vadd.f32 1.0, %v1445_v33  ;;  %v925_v45 = vsel %vm888_vm8, %v1800_v34, 0.0 }
 0x3a1   :  { %v1808_v46 = vmul.f32 %v869_v35, %v757_v32  ;;  %v871_v47 = vadd.f32 1.0, %v1447_v41  ;;  %923 = vadd.xlane.f32.xlu0 %v922_v36  ;;  %926 = vadd.xlane.f32.xlu1 %v925_v45 }
 0x3a2   :  { %v1810_v48 = vmul.f32 %v870_v44, %v758_v61 }
 0x3a3   :  { %v928_v12 = vsel %vm888_vm8, %v1808_v46, 0.0  ;;  %v1817_v52 = vmul.f32 %v871_v47, %v759_v51 }
 0x3a4   :  { %v931_v50 = vsel %vm888_vm8, %v1810_v48, 0.0 }
 0x3a5   :  { %929 = vadd.xlane.f32.xlu0 %v928_v12  ;;  %932 = vadd.xlane.f32.xlu1 %v931_v50  ;;  %v934_v53 = vsel %vm888_vm8, %v1817_v52, 0.0 }
 0x3a9   :  { %935 = vadd.xlane.f32.xlu0 %v934_v53 }
 0x412   :  { %v891_v54 = vpop.xlane.xlu0 %890 }
 0x413   :  { %v938_v56 = vmul.f32 0.03125, %v891_v54 }
 0x415   :  { %v1822_v39 = vsub.f32 %v1737_v18, %v938_v56 }
 0x416   :  { %v897_v58 = vpop.xlane.xlu0 %896  ;;  %v894_v59 = vpop.xlane.xlu1 %893 }
 0x417   :  { %v940_v62 = vmul.f32 0.03125, %v897_v58  ;;  %v939_v14 = vmul.f32 0.03125, %v894_v59  ;;  %v970_v63 = vmul.f32 %v1822_v39, %v1822_v39 }
 0x419   :  { %v1827_v0 = vsub.f32 %v1745_v27, %v940_v62  ;;  %v1830_v1 = vsub.f32 %v1750_v38, %v939_v14  ;;  %v986_v55 = vsel %vm888_vm8, %v970_v63, 0.0 }
 0x41a   :  { %v900_v2 = vpop.xlane.xlu0 %899  ;;  %v903_v26 = vpop.xlane.xlu1 %902  ;;  %987 = vadd.xlane.f32.xlu1 %v986_v55 }
 0x41b   :  { %v941_v18 = vmul.f32 0.03125, %v900_v2  ;;  %v942_v9 = vmul.f32 0.03125, %v903_v26  ;;  %v971_v5 = vmul.f32 %v1830_v1, %v1830_v1  ;;  %v972_v6 = vmul.f32 %v1827_v0, %v1827_v0 }
 0x41d   :  { %v1838_v8 = vsub.f32 %v1752_v40, %v941_v18  ;;  %v1841_v27 = vsub.f32 %v1763_v57, %v942_v9  ;;  %v989_v38 = vsel %vm888_vm8, %v971_v5, 0.0  ;;  %v992_v10 = vsel %vm888_vm8, %v972_v6, 0.0 }
 0x41e   :  { %v906_v11 = vpop.xlane.xlu0 %905  ;;  %v909_v3 = vpop.xlane.xlu1 %908  ;;  %990 = vadd.xlane.f32.xlu0 %v989_v38  ;;  %993 = vadd.xlane.f32.xlu1 %v992_v10 }
 0x41f   :  { %v943_v60 = vmul.f32 0.03125, %v906_v11  ;;  %v944_v13 = vmul.f32 0.03125, %v909_v3  ;;  %v973_v15 = vmul.f32 %v1838_v8, %v1838_v8  ;;  %v974_v40 = vmul.f32 %v1841_v27, %v1841_v27  ;;  %v1140_v3 = vld [vmem:[#allocation4 + $0x50] sm:$0xff] }
 0x421   :  { %v1850_v16 = vsub.f32 %v1770_v4, %v943_v60  ;;  %v1853_v57 = vsub.f32 %v1766_v42, %v944_v13  ;;  %v995_v19 = vsel %vm888_vm8, %v973_v15, 0.0  ;;  %v998_v20 = vsel %vm888_vm8, %v974_v40, 0.0  ;;  %v1141_v60 = vld [vmem:[#allocation4 + $0x58] sm:$0xff]  ;;  %v1138_v15 = vld [vmem:[#allocation4 + $0x40] sm:$0xff]  ;;  %v1139_v40 = vld [vmem:[#allocation4 + $0x48] sm:$0xff] }
 0x422   :  { %v912_v25 = vpop.xlane.xlu0 %911  ;;  %996 = vadd.xlane.f32.xlu0 %v995_v19  ;;  %999 = vadd.xlane.f32.xlu1 %v998_v20  ;;  %v915_v23 = vpop.xlane.xlu1 %914  ;;  %v1151_v13 = vpack.c.bf16 %v1141_v60, %v1140_v3 }
 0x423   :  { %v945_v17 = vmul.f32 0.03125, %v912_v25  ;;  %v975_v24 = vmul.f32 %v1850_v16, %v1850_v16  ;;  %v976_v37 = vmul.f32 %v1853_v57, %v1853_v57  ;;  %v946_v4 = vmul.f32 0.03125, %v915_v23 }
 0x424   :  { %1389 = vmatprep.subr.bf16.mxu1 %v1151_v13 }
 0x425   :  { %v1862_v28 = vsub.f32 %v1777_v7, %v945_v17  ;;  %v1001_v42 = vsel %vm888_vm8, %v975_v24, 0.0  ;;  %v1004_v29 = vsel %vm888_vm8, %v976_v37, 0.0  ;;  %v1867_v30 = vsub.f32 %v1780_v49, %v946_v4  ;;  %1390 = vmatpush3.bf16.msra.mxu1 %v1151_v13 }
 0x426   :  { %1002 = vadd.xlane.f32.xlu0 %v1001_v42  ;;  %1005 = vadd.xlane.f32.xlu1 %v1004_v29  ;;  %v918_v31 = vpop.xlane.xlu0 %917  ;;  %v921_v33 = vpop.xlane.xlu1 %920 }
 0x427   :  { %v977_v32 = vmul.f32 %v1862_v28, %v1862_v28  ;;  %v947_v35 = vmul.f32 0.03125, %v918_v31  ;;  %v948_v41 = vmul.f32 0.03125, %v921_v33  ;;  %v978_v7 = vmul.f32 %v1867_v30, %v1867_v30 }
 0x429   :  { %v1007_v61 = vsel %vm888_vm8, %v977_v32, 0.0  ;;  %v1875_v44 = vsub.f32 %v1790_v22, %v947_v35  ;;  %v1878_v49 = vsub.f32 %v1788_v21, %v948_v41  ;;  %v1010_v36 = vsel %vm888_vm8, %v978_v7, 0.0 }
 0x42a   :  { %1008 = vadd.xlane.f32.xlu0 %v1007_v61  ;;  %v924_v45 = vpop.xlane.xlu0 %923  ;;  %1011 = vadd.xlane.f32.xlu1 %v1010_v36  ;;  %v927_v47 = vpop.xlane.xlu1 %926 }
 0x42b   :  { %v949_v12 = vmul.f32 0.03125, %v924_v45  ;;  %v950_v51 = vmul.f32 0.03125, %v927_v47  ;;  %v979_v50 = vmul.f32 %v1875_v44, %v1875_v44  ;;  %v980_v53 = vmul.f32 %v1878_v49, %v1878_v49 }
 0x42d   :  { %v1886_v22 = vsub.f32 %v1798_v43, %v949_v12  ;;  %v1889_v21 = vsub.f32 %v1800_v34, %v950_v51  ;;  %v1013_v54 = vsel %vm888_vm8, %v979_v50, 0.0  ;;  %v1016_v56 = vsel %vm888_vm8, %v980_v53, 0.0 }
 0x42e   :  { %1014 = vadd.xlane.f32.xlu0 %v1013_v54  ;;  %v930_v58 = vpop.xlane.xlu0 %929  ;;  %1017 = vadd.xlane.f32.xlu1 %v1016_v56  ;;  %v933_v59 = vpop.xlane.xlu1 %932 }
 0x42f   :  { %v951_v62 = vmul.f32 0.03125, %v930_v58  ;;  %v952_v14 = vmul.f32 0.03125, %v933_v59  ;;  %v981_v63 = vmul.f32 %v1886_v22, %v1886_v22  ;;  %v982_v43 = vmul.f32 %v1889_v21, %v1889_v21  ;;  %v1917_v58 = vld [vmem:[#allocation4 + $0x39] ss:$0 sm:$0xff] }
 0x431   :  { %v1898_v55 = vsub.f32 %v1808_v46, %v951_v62  ;;  %v1901_v34 = vsub.f32 %v1810_v48, %v952_v14  ;;  %v1019_v2 = vsel %vm888_vm8, %v981_v63, 0.0  ;;  %v1022_v26 = vsel %vm888_vm8, %v982_v43, 0.0 }
 0x432   :  { %1020 = vadd.xlane.f32.xlu0 %v1019_v2  ;;  %v936_v18 = vpop.xlane.xlu0 %935  ;;  %1023 = vadd.xlane.f32.xlu1 %v1022_v26 }
 0x433   :  { %v953_v9 = vmul.f32 0.03125, %v936_v18  ;;  %v983_v5 = vmul.f32 %v1898_v55, %v1898_v55  ;;  %v984_v6 = vmul.f32 %v1901_v34, %v1901_v34 }
 0x435   :  { %v1910_v46 = vsub.f32 %v1817_v52, %v953_v9  ;;  %v1025_v48 = vsel %vm888_vm8, %v983_v5, 0.0  ;;  %v1028_v38 = vsel %vm888_vm8, %v984_v6, 0.0  ;;  %v1150_v52 = vpack.c.bf16 %v1139_v40, %v1138_v15  ;;  %v1921_v6 = vld [vmem:[#allocation4 + $0x3a] ss:$0 sm:$0xff] }
 0x436   :  { %1026 = vadd.xlane.f32.xlu0 %v1025_v48  ;;  %1029 = vadd.xlane.f32.xlu1 %v1028_v38 }
 0x437   :  { %v985_v10 = vmul.f32 %v1910_v46, %v1910_v46  ;;  %1391 = vmatprep.subr.bf16.mxu1 %v1150_v52 }
 0x438   :  { %1392 = vmatpush3.bf16.msra.mxu1 %v1150_v52 }
 0x439   :  { %v1031_v11 = vsel %vm888_vm8, %v985_v10, 0.0 }
 0x43a   :  { %1032 = vadd.xlane.f32.xlu0 %v1031_v11 }
 0x4a3   :  { %v988_v19 = vpop.xlane.xlu1 %987 }
 0x4a4   :  { %v1034_v20 = vmul.f32 0.03125, %v988_v19 }
 0x4a6   :  { %v1050_v25 = vadd.f32 1e-05, %v1034_v20 }
 0x4a7   :  { %v991_v17 = vpop.xlane.xlu0 %990  ;;  %v994_v23 = vpop.xlane.xlu1 %993 }
 0x4a8   :  { %1448 = vrsqrt.f32 %v1050_v25  ;;  %v1035_v24 = vmul.f32 0.03125, %v991_v17  ;;  %v1036_v37 = vmul.f32 0.03125, %v994_v23 }
 0x4aa   :  { %v1051_v4 = vadd.f32 1e-05, %v1035_v24  ;;  %v1052_v42 = vadd.f32 1e-05, %v1036_v37 }
 0x4ab   :  { %v997_v29 = vpop.xlane.xlu0 %996  ;;  %v1000_v31 = vpop.xlane.xlu1 %999 }
 0x4ac   :  { %1450 = vrsqrt.f32 %v1051_v4  ;;  %v1037_v33 = vmul.f32 0.03125, %v997_v29  ;;  %v1038_v32 = vmul.f32 0.03125, %v1000_v31 }
 0x4ad   :  { %1452 = vrsqrt.f32 %v1052_v42 }
 0x4ae   :  { %v1053_v35 = vadd.f32 1e-05, %v1037_v33  ;;  %v1054_v41 = vadd.f32 1e-05, %v1038_v32 }
 0x4af   :  { %v1003_v7 = vpop.xlane.xlu0 %1002  ;;  %v1006_v61 = vpop.xlane.xlu1 %1005 }
 0x4b0   :  { %1454 = vrsqrt.f32 %v1053_v35  ;;  %v1039_v36 = vmul.f32 0.03125, %v1003_v7  ;;  %v1040_v45 = vmul.f32 0.03125, %v1006_v61 }
 0x4b1   :  { %1456 = vrsqrt.f32 %v1054_v41 }
 0x4b2   :  { %v1055_v47 = vadd.f32 1e-05, %v1039_v36  ;;  %v1056_v12 = vadd.f32 1e-05, %v1040_v45 }
 0x4b3   :  { %v1009_v51 = vpop.xlane.xlu0 %1008  ;;  %v1012_v53 = vpop.xlane.xlu1 %1011 }
 0x4b4   :  { %1458 = vrsqrt.f32 %v1055_v47  ;;  %v1041_v50 = vmul.f32 0.03125, %v1009_v51  ;;  %v1042_v56 = vmul.f32 0.03125, %v1012_v53 }
 0x4b5   :  { %v1449_v54 = vpop.eup %1448  ;;  %1460 = vrsqrt.f32 %v1056_v12 }
 0x4b6   :  { %v1057_v59 = vadd.f32 1e-05, %v1041_v50  ;;  %v1082_v62 = vmul.f32 %v1449_v54, %v1822_v39  ;;  %v1058_v14 = vadd.f32 1e-05, %v1042_v56 }
 0x4b7   :  { %v1015_v63 = vpop.xlane.xlu0 %1014  ;;  %v1018_v43 = vpop.xlane.xlu1 %1017 }
 0x4b8   :  { %1462 = vrsqrt.f32 %v1057_v59  ;;  %v1043_v26 = vmul.f32 0.03125, %v1015_v63  ;;  %v1044_v18 = vmul.f32 0.03125, %v1018_v43  ;;  %v1102_v9 = vmul.f32 %v1917_v58, %v1082_v62 }
 0x4b9   :  { %v1451_v2 = vpop.eup %1450  ;;  %1464 = vrsqrt.f32 %v1058_v14 }
 0x4ba   :  { %v1453_v5 = vpop.eup %1452  ;;  %v1083_v48 = vmul.f32 %v1451_v2, %v1830_v1  ;;  %v1059_v10 = vadd.f32 1e-05, %v1043_v26  ;;  %v1060_v11 = vadd.f32 1e-05, %v1044_v18  ;;  %v1122_v52 = vadd.f32 %v1921_v6, %v1102_v9 }
 0x4bb   :  { %v1084_v38 = vmul.f32 %v1453_v5, %v1827_v0  ;;  %v1021_v39 = vpop.xlane.xlu0 %1020  ;;  %v1024_v3 = vpop.xlane.xlu1 %1023 }
 0x4bc   :  { %v1103_v60 = vmul.f32 %v1917_v58, %v1083_v48  ;;  %1466 = vrsqrt.f32 %v1059_v10  ;;  %v1045_v15 = vmul.f32 0.03125, %v1021_v39  ;;  %v1046_v40 = vmul.f32 0.03125, %v1024_v3 }
 0x4bd   :  { %v1455_v13 = vpop.eup %1454  ;;  %v1104_v20 = vmul.f32 %v1917_v58, %v1084_v38  ;;  %1468 = vrsqrt.f32 %v1060_v11 }
 0x4be   :  { %v1457_v19 = vpop.eup %1456  ;;  %v1085_v25 = vmul.f32 %v1455_v13, %v1838_v8  ;;  %v1123_v0 = vadd.f32 %v1921_v6, %v1103_v60  ;;  %v1061_v1 = vadd.f32 1e-05, %v1045_v15  ;;  %v1062_v17 = vadd.f32 1e-05, %v1046_v40 }
 0x4bf   :  { %v1086_v23 = vmul.f32 %v1457_v19, %v1841_v27  ;;  %v1027_v37 = vpop.xlane.xlu0 %1026  ;;  %v1030_v4 = vpop.xlane.xlu1 %1029  ;;  %v1124_v8 = vadd.f32 %v1921_v6, %v1104_v20 }
 0x4c0   :  { %v1105_v24 = vmul.f32 %v1917_v58, %v1085_v25  ;;  %v1142_v42 = vpack.c.bf16 %v1123_v0, %v1122_v52  ;;  %1470 = vrsqrt.f32 %v1061_v1  ;;  %v1047_v31 = vmul.f32 0.03125, %v1027_v37 }
 0x4c1   :  { %v1459_v29 = vpop.eup %1458  ;;  %v1048_v33 = vmul.f32 0.03125, %v1030_v4  ;;  %v1106_v32 = vmul.f32 %v1917_v58, %v1086_v23  ;;  %1472 = vrsqrt.f32 %v1062_v17 }
 0x4c2   :  { %v1461_v35 = vpop.eup %1460  ;;  %1393 = vmatprep.mubr.msk.bf16.mxu1 %vm888_vm8, %v1142_v42  ;;  %v1125_v41 = vadd.f32 %v1921_v6, %v1105_v24  ;;  %v1087_v27 = vmul.f32 %v1459_v29, %v1850_v16  ;;  %v1063_v7 = vadd.f32 1e-05, %v1047_v31  ;;  %v1319_v31 = vld [vmem:[#allocation4 + $0x60] ss:$0 sm:$0xff] }
 0x4c3   :  { %v1064_v61 = vadd.f32 1e-05, %v1048_v33  ;;  %v1088_v36 = vmul.f32 %v1461_v35, %v1853_v57  ;;  %v1033_v45 = vpop.xlane.xlu0 %1032  ;;  %v1126_v53 = vadd.f32 %v1921_v6, %v1106_v32 }
 0x4c4   :  { %v1143_v47 = vpack.c.bf16 %v1125_v41, %v1124_v8  ;;  %v1107_v12 = vmul.f32 %v1917_v58, %v1087_v27  ;;  %1474 = vrsqrt.f32 %v1063_v7  ;;  %v1049_v50 = vmul.f32 0.03125, %v1033_v45 }
 0x4c5   :  { %v1463_v51 = vpop.eup %1462  ;;  %1476 = vrsqrt.f32 %v1064_v61  ;;  %v1108_v59 = vmul.f32 %v1917_v58, %v1088_v36 }
 0x4c6   :  { %v1465_v54 = vpop.eup %1464  ;;  %1394 = vmatmul.mubr.msk.bf16.vlgmr.msra.gmra.mxu1 %vm888_vm8, %v1143_v47  ;;  %v1127_v56 = vadd.f32 %v1921_v6, %v1107_v12  ;;  %v1089_v16 = vmul.f32 %v1463_v51, %v1862_v28  ;;  %v1065_v57 = vadd.f32 1e-05, %v1049_v50 }
 0x4c7   :  { %v1090_v62 = vmul.f32 %v1465_v54, %v1867_v30  ;;  %v1128_v2 = vadd.f32 %v1921_v6, %v1108_v59 }
 0x4c8   :  { %v1144_v14 = vpack.c.bf16 %v1127_v56, %v1126_v53  ;;  %v1109_v63 = vmul.f32 %v1917_v58, %v1089_v16  ;;  %1478 = vrsqrt.f32 %v1065_v57 }
 0x4c9   :  { %v1467_v43 = vpop.eup %1466  ;;  %v1110_v28 = vmul.f32 %v1917_v58, %v1090_v62 }
 0x4ca   :  { %1397 = vmatprep.mubr.msk.bf16.mxu1 %vm888_vm8, %v1144_v14  ;;  %v1129_v26 = vadd.f32 %v1921_v6, %v1109_v63  ;;  %v1469_v18 = vpop.eup %1468  ;;  %v1091_v9 = vmul.f32 %v1467_v43, %v1875_v44 }
 0x4cb   :  { %v1092_v48 = vmul.f32 %v1469_v18, %v1878_v49  ;;  %v1130_v11 = vadd.f32 %v1921_v6, %v1110_v28 }
 0x4cc   :  { %v1145_v5 = vpack.c.bf16 %v1129_v26, %v1128_v2  ;;  %v1111_v30 = vmul.f32 %v1917_v58, %v1091_v9 }
 0x4cd   :  { %v1471_v38 = vpop.eup %1470  ;;  %v1112_v60 = vmul.f32 %v1917_v58, %v1092_v48 }
 0x4ce   :  { %1398 = vmatmul.mubr.msk.bf16.gmra.mxu1 %vm888_vm8, %v1145_v5  ;;  %v1473_v10 = vpop.eup %1472  ;;  %v1131_v39 = vadd.f32 %v1921_v6, %v1111_v30  ;;  %v1093_v3 = vmul.f32 %v1471_v38, %v1886_v22 }
 0x4cf   :  { %v1094_v44 = vmul.f32 %v1473_v10, %v1889_v21  ;;  %v1132_v52 = vadd.f32 %v1921_v6, %v1112_v60 }
 0x4d0   :  { %v1146_v13 = vpack.c.bf16 %v1131_v39, %v1130_v11  ;;  %v1113_v15 = vmul.f32 %v1917_v58, %v1093_v3 }
 0x4d1   :  { %v1475_v49 = vpop.eup %1474  ;;  %v1114_v25 = vmul.f32 %v1917_v58, %v1094_v44 }
 0x4d2   :  { %v1477_v40 = vpop.eup %1476  ;;  %1401 = vmatprep.mubr.msk.bf16.mxu1 %vm888_vm8, %v1146_v13  ;;  %v1133_v19 = vadd.f32 %v1921_v6, %v1113_v15  ;;  %v1095_v20 = vmul.f32 %v1475_v49, %v1898_v55 }
 0x4d3   :  { %v1096_v22 = vmul.f32 %v1477_v40, %v1901_v34  ;;  %v1134_v17 = vadd.f32 %v1921_v6, %v1114_v25 }
 0x4d4   :  { %v1147_v0 = vpack.c.bf16 %v1133_v19, %v1132_v52  ;;  %v1115_v21 = vmul.f32 %v1917_v58, %v1095_v20 }
 0x4d5   :  { %v1479_v1 = vpop.eup %1478  ;;  %v1116_v37 = vmul.f32 %v1917_v58, %v1096_v22 }
 0x4d6   :  { %1402 = vmatmul.mubr.msk.bf16.gmra.mxu1 %vm888_vm8, %v1147_v0  ;;  %v1135_v23 = vadd.f32 %v1921_v6, %v1115_v21  ;;  %v1097_v24 = vmul.f32 %v1479_v1, %v1910_v46 }
 0x4d7   :  { %v1136_v34 = vadd.f32 %v1921_v6, %v1116_v37 }
 0x4d8   :  { %v1148_v4 = vpack.c.bf16 %v1135_v23, %v1134_v17  ;;  %v1117_v55 = vmul.f32 %v1917_v58, %v1097_v24 }
 0x4da   :  { %1405 = vmatprep.mubr.msk.bf16.mxu1 %vm888_vm8, %v1148_v4  ;;  %v1137_v42 = vadd.f32 %v1921_v6, %v1117_v55 }
 0x4dc   :  { %v1149_v29 = vpack.c.bf16 %v1137_v42, %v1136_v34 }
 0x4de   :  { %1406 = vmatmul.mubr.msk.bf16.gmra.mxu1 %vm888_vm8, %v1149_v29 }
 0x586   :  { %v1395_v33 = vpop.f32.mrf.mxu1 }
 0x587   :  { %v1224_v32 = vadd.f32 %v1395_v33, %v1319_v31 }
 0x588   :  { %v1215_v35 = vpop.f32.mrf.mxu1 }
 0x589   :  { %1281 = vst.msk [vmem:[%s2043_s2 + $0x10] sm:$0xff] %vm1278_vm9, %v1224_v32  ;;  %v1216_v46 = vadd.f32 %v1319_v31, %v1215_v35 }
 0x58a   :  { %v1396_v58 = vpop.f32.mrf.mxu1 }
 0x58b   :  { %1279 = vst.msk [vmem:[%s2043_s2] sm:$0xff] %vm1278_vm9, %v1216_v46  ;;  %v1227_v6 = vadd.f32 %v1396_v58, %v1319_v31 }
 0x58c   :  { %v1218_v8 = vpop.f32.mrf.mxu1 }
 0x58d   :  { %1282 = vst.msk [vmem:[%s2043_s2 + $0x18] sm:$0xff] %vm1278_vm9, %v1227_v6  ;;  %v1219_v41 = vadd.f32 %v1319_v31, %v1218_v8 }
 0x58e   :  { %v1399_v27 = vpop.f32.mrf.mxu1 }
 0x58f   :  { %1280 = vst.msk [vmem:[%s2043_s2 + $0x8] sm:$0xff] %vm1278_vm9, %v1219_v41  ;;  %v1240_v7 = vadd.f32 %v1399_v27, %v1319_v31 }
 0x590   :  { %v1231_v61 = vpop.f32.mrf.mxu1 }
 0x591   :  { %1285 = vst.msk [vmem:[%s2043_s2 + $0x30] sm:$0xff] %vm1278_vm9, %v1240_v7  ;;  %v1232_v36 = vadd.f32 %v1319_v31, %v1231_v61 }
 0x592   :  { %v1400_v45 = vpop.f32.mrf.mxu1 }
 0x593   :  { %1283 = vst.msk [vmem:[%s2043_s2 + $0x20] sm:$0xff] %vm1278_vm9, %v1232_v36  ;;  %v1243_v47 = vadd.f32 %v1400_v45, %v1319_v31 }
 0x594   :  { %v1234_v12 = vpop.f32.mrf.mxu1 }
 0x595   :  { %1286 = vst.msk [vmem:[%s2043_s2 + $0x38] sm:$0xff] %vm1278_vm9, %v1243_v47  ;;  %v1235_v51 = vadd.f32 %v1319_v31, %v1234_v12 }
 0x596   :  { %v1403_v50 = vpop.f32.mrf.mxu1 }
 0x597   :  { %1284 = vst.msk [vmem:[%s2043_s2 + $0x28] sm:$0xff] %vm1278_vm9, %v1235_v51  ;;  %v1256_v53 = vadd.f32 %v1403_v50, %v1319_v31 }
 0x598   :  { %v1247_v54 = vpop.f32.mrf.mxu1 }
 0x599   :  { %1289 = vst.msk [vmem:[%s2043_s2 + $0x50] sm:$0xff] %vm1278_vm9, %v1256_v53  ;;  %v1248_v56 = vadd.f32 %v1319_v31, %v1247_v54 }
 0x59a   :  { %v1404_v16 = vpop.f32.mrf.mxu1 }
 0x59b   :  { %1287 = vst.msk [vmem:[%s2043_s2 + $0x40] sm:$0xff] %vm1278_vm9, %v1248_v56  ;;  %v1259_v59 = vadd.f32 %v1404_v16, %v1319_v31 }
 0x59c   :  { %v1250_v57 = vpop.f32.mrf.mxu1 }
 0x59d   :  { %1290 = vst.msk [vmem:[%s2043_s2 + $0x58] sm:$0xff] %vm1278_vm9, %v1259_v59  ;;  %v1251_v62 = vadd.f32 %v1319_v31, %v1250_v57 }
 0x59e   :  { %v1407_v14 = vpop.f32.mrf.mxu1 }
 0x59f   :  { %1288 = vst.msk [vmem:[%s2043_s2 + $0x48] sm:$0xff] %vm1278_vm9, %v1251_v62  ;;  %v1272_v63 = vadd.f32 %v1407_v14, %v1319_v31 }
 0x5a0   :  { %v1263_v43 = vpop.f32.mrf.mxu1 }
 0x5a1   :  { %1293 = vst.msk [vmem:[%s2043_s2 + $0x70] sm:$0xff] %vm1278_vm9, %v1272_v63  ;;  %v1264_v2 = vadd.f32 %v1319_v31, %v1263_v43 }
 0x5a2   :  { %v1408_v26 = vpop.f32.mrf.mxu1 }
 0x5a3   :  { %1291 = vst.msk [vmem:[%s2043_s2 + $0x60] sm:$0xff] %vm1278_vm9, %v1264_v2  ;;  %v1275_v18 = vadd.f32 %v1408_v26, %v1319_v31 }
 0x5a4   :  { %v1266_v9 = vpop.f32.mrf.mxu1 }
 0x5a5   :  { %1294 = vst.msk [vmem:[%s2043_s2 + $0x78] sm:$0xff] %vm1278_vm9, %v1275_v18  ;;  %v1267_v28 = vadd.f32 %v1319_v31, %v1266_v9 }
 0x5a7   :  { %1292 = vst.msk [vmem:[%s2043_s2 + $0x68] sm:$0xff] %vm1278_vm9, %v1267_v28 }
 0x5a8   :  { %1299 = vsyncpa [#allocation5], 1 }

</bundles_post_ra>
